<compile_context>
chip_gen: v5e
topology: v5e:2x2
jax: 0.10.0
libtpu: 0.0.40
codegen_flags: <defaults>
</compile_context>

<pallas_src>
import jax
import jax.numpy as jnp
import numpy as np
from jax.experimental import pallas as pl
from jax.experimental.pallas import tpu as pltpu

# ---------------- model hyper-parameters (small, consistent with the module) ------------
INPUT_SIZE = 32
OUTPUT_SIZE = 10
OUT_PAD = 128           # lane-dense padded output width
LINEAR_SIZE = 256
NUM_STAGE = 3
BN_EPS = 1e-5
BATCH = 16


# ---------------------------------- Pallas kernel ---------------------------------------
def mono_kernel(x_ref, w1_ref, sw_ref, w2_ref, bias_ref, o_ref):
    bf16 = jnp.bfloat16
    biases = bias_ref[...]                                    # (8, LINEAR_SIZE) f32

    # y = relu(bn1(w1(x)))  with BN folded into w1/bias; dropout == identity
    x = x_ref[...].astype(bf16)                               # (B, INPUT_SIZE)
    y = jnp.dot(x, w1_ref[...], preferred_element_type=jnp.float32) + biases[0:1, :]
    y = jnp.maximum(y, 0.0)

    # residual Linear stages (BN folded), static unroll
    for i in range(NUM_STAGE):
        h = jnp.dot(y.astype(bf16), sw_ref[2 * i],
                    preferred_element_type=jnp.float32) + biases[1 + i:2 + i, :]
        h = jnp.maximum(h, 0.0)
        h = jnp.dot(h.astype(bf16), sw_ref[2 * i + 1],
                    preferred_element_type=jnp.float32) + biases[1 + NUM_STAGE + i:
                                                                 2 + NUM_STAGE + i, :]
        h = jnp.maximum(h, 0.0)
        y = y + h

    # output head (padded to 128 lanes); its bias lives in row 7 of the packed operand
    out = jnp.dot(y.astype(bf16), w2_ref[...],
                  preferred_element_type=jnp.float32) + biases[7:8, 0:OUT_PAD]
    o_ref[...] = out.astype(o_ref.dtype)


def mono_model_pallas(x, kparams):
    w1f, sw, w2p, biases = kparams
    vmem = pl.BlockSpec(memory_space=pltpu.MemorySpace.VMEM)  # full array, resident in VMEM
    out_padded = pl.pallas_call(
        mono_kernel,
        out_shape=jax.ShapeDtypeStruct((x.shape[0], OUT_PAD), jnp.float32),
        in_specs=[vmem] * 5,
        out_specs=vmem,
    )(x, w1f, sw, w2p, biases)
    return out_padded[:, :OUTPUT_SIZE]


# -------------------------- deterministic parameter init --------------------------------
def init_params(key):
    ks = jax.random.split(key, 16)

    def lin(k, fan_in, fan_out):
        bound = 1.0 / np.sqrt(fan_in)
        kw, kb = jax.random.split(k)
        w = jax.random.uniform(kw, (fan_in, fan_out), jnp.float32, -bound, bound)
        b = jax.random.uniform(kb, (1, fan_out), jnp.float32, -bound, bound)
        return w, b

    def bn_fold(k, n):
        # gamma ~ U(0.5, 1.5), beta ~ U(-0.1, 0.1); running_mean=0, running_var=1
        kg, kb = jax.random.split(k)
        gamma = jax.random.uniform(kg, (1, n), jnp.float32, 0.5, 1.5)
        beta = jax.random.uniform(kb, (1, n), jnp.float32, -0.1, 0.1)
        mean = jnp.zeros((1, n), jnp.float32)
        var = jnp.ones((1, n), jnp.float32)
        s = gamma / jnp.sqrt(var + BN_EPS)
        t = beta - mean * s
        return s, t

    w1, b1 = lin(ks[0], INPUT_SIZE, LINEAR_SIZE)
    s0, t0 = bn_fold(ks[1], LINEAR_SIZE)

    sw1, sb1, ss1, st1 = [], [], [], []
    sw2, sb2, ss2, st2 = [], [], [], []
    for st_i in range(NUM_STAGE):
        k = ks[2 + st_i]
        k1, k2, k3, k4 = jax.random.split(k, 4)
        w_a, b_a = lin(k1, LINEAR_SIZE, LINEAR_SIZE)
        s_a, t_a = bn_fold(k2, LINEAR_SIZE)
        w_b, b_b = lin(k3, LINEAR_SIZE, LINEAR_SIZE)
        s_b, t_b = bn_fold(k4, LINEAR_SIZE)
        sw1.append(w_a); sb1.append(b_a[0]); ss1.append(s_a[0]); st1.append(t_a[0])
        sw2.append(w_b); sb2.append(b_b[0]); ss2.append(s_b[0]); st2.append(t_b[0])

    sw1 = jnp.stack(sw1); sb1 = jnp.stack(sb1); ss1 = jnp.stack(ss1); st1 = jnp.stack(st1)
    sw2 = jnp.stack(sw2); sb2 = jnp.stack(sb2); ss2 = jnp.stack(ss2); st2 = jnp.stack(st2)

    w2, b2 = lin(ks[2 + NUM_STAGE], LINEAR_SIZE, OUTPUT_SIZE)

    return (w1, b1, s0, t0,
            sw1, sb1, ss1, st1,
            sw2, sb2, ss2, st2,
            w2, b2)


# ---------------- host-side folding: BN -> weights, pack biases, pad head, bf16 ----------
def fold_params(params):
    (w1, b1, s0, t0,
     sw1, sb1, ss1, st1,
     sw2, sb2, ss2, st2,
     w2, b2) = params

    # fold BN scale into preceding Linear weight; merge shift into bias
    w1f = w1 * s0                                   # (IN, L)
    b1f = (b1 * s0 + t0)[0]                         # (L,)
    swa = sw1 * ss1[:, None, :]                     # (S, L, L)
    sba = sb1 * ss1 + st1                           # (S, L)
    swb = sw2 * ss2[:, None, :]
    sbb = sb2 * ss2 + st2

    # interleave the stage weights into one stacked operand: [a0, b0, a1, b1, a2, b2]
    sw = jnp.stack([w for pair in zip(swa, swb) for w in pair])   # (2S, L, L)

    # pack ALL bias vectors into one sublane-aligned (8, L) operand
    #   row 0        : input-layer bias (BN folded)
    #   rows 1..S    : stage first-linear biases
    #   rows S+1..2S : stage second-linear biases
    #   row 7        : output-head bias, zero-padded to OUT_PAD lanes
    biases = jnp.zeros((8, LINEAR_SIZE), jnp.float32)
    biases = biases.at[0].set(b1f)
    biases = biases.at[1:1 + NUM_STAGE].set(sba)
    biases = biases.at[1 + NUM_STAGE:1 + 2 * NUM_STAGE].set(sbb)
    biases = biases.at[7, :OUTPUT_SIZE].set(b2[0])

    # pad output head to 128 lanes (lane-dense stores); sliced back outside the kernel
    w2p = jnp.zeros((LINEAR_SIZE, OUT_PAD), jnp.float32).at[:, :OUTPUT_SIZE].set(w2)

    return (w1f.astype(jnp.bfloat16), sw.astype(jnp.bfloat16),
            w2p.astype(jnp.bfloat16), biases)


# -------------------------------- references ---------------------------------------------
def mono_model_ref_f32(x, params):
    """Original-module semantics, pure f32 (BN eval-mode, dropout identity)."""
    (w1, b1, s0, t0,
     sw1, sb1, ss1, st1,
     sw2, sb2, ss2, st2,
     w2, b2) = params
    y = x @ w1 + b1
    y = y * s0 + t0
    y = jnp.maximum(y, 0.0)
    for i in range(NUM_STAGE):
        h = y @ sw1[i] + sb1[i]
        h = h * ss1[i] + st1[i]
        h = jnp.maximum(h, 0.0)
        h = h @ sw2[i] + sb2[i]
        h = h * ss2[i] + st2[i]
        h = jnp.maximum(h, 0.0)
        y = y + h
    return y @ w2 + b2


def mono_model_ref_mirror(x, kparams):
    """Mirrors the kernel math exactly (folded bf16 weights, f32 accumulation)."""
    w1f, sw, w2p, biases = kparams
    bf16 = jnp.bfloat16
    y = jnp.dot(x.astype(bf16), w1f, preferred_element_type=jnp.float32) + biases[0:1, :]
    y = jnp.maximum(y, 0.0)
    for i in range(NUM_STAGE):
        h = jnp.dot(y.astype(bf16), sw[2 * i],
                    preferred_element_type=jnp.float32) + biases[1 + i:2 + i, :]
        h = jnp.maximum(h, 0.0)
        h = jnp.dot(h.astype(bf16), sw[2 * i + 1],
                    preferred_element_type=jnp.float32) + biases[1 + NUM_STAGE + i:
                                                                 2 + NUM_STAGE + i, :]
        h = jnp.maximum(h, 0.0)
        y = y + h
    out = jnp.dot(y.astype(bf16), w2p,
                  preferred_element_type=jnp.float32) + biases[7:8, 0:OUT_PAD]
    return out[:, :OUTPUT_SIZE]


# ---------------------------------------- main -------------------------------------------
if __name__ == "__main__":
    key = jax.random.PRNGKey(0)
    kx, kp = jax.random.split(key)

    x = jax.random.normal(kx, (BATCH, INPUT_SIZE), jnp.float32)
    params = init_params(kp)
    kparams = fold_params(params)

    out = mono_model_pallas(x, kparams)
    out = jax.block_until_ready(out)
    out_np = np.asarray(out)

    # exact-math mirror (same folded bf16 weights) — tight check
    ref_mirror = np.asarray(mono_model_ref_mirror(x, kparams))
    np.testing.assert_allclose(out_np, ref_mirror, rtol=1e-3, atol=1e-3)

    # original-module f32 semantics — loose check (bf16 weight quantization)
    ref_f32 = np.asarray(mono_model_ref_f32(x, params))
    np.testing.assert_allclose(out_np, ref_f32, rtol=1e-1, atol=1e-1)

    print("KERNEL_OK")
</pallas_src>

<mosaic_0001>
module attributes {stable_mosaic.version = 11 : i64} {
  func.func @mono_kernel(%arg0: memref<16x32xf32, #tpu.memory_space<vmem>>, %arg1: memref<32x256xbf16, #tpu.memory_space<vmem>>, %arg2: memref<6x256x256xbf16, #tpu.memory_space<vmem>>, %arg3: memref<256x128xbf16, #tpu.memory_space<vmem>>, %arg4: memref<8x256xf32, #tpu.memory_space<vmem>>, %arg5: memref<16x128xf32, #tpu.memory_space<vmem>>) attributes {dimension_semantics = [], scalar_prefetch = 0 : i64, scratch_operands = 0 : i64, tpu.core_type = #tpu.core_type<tc>} {
    %c0 = arith.constant 0 : index
    %c0_0 = arith.constant 0 : index
    %0 = vector.load %arg4[%c0, %c0_0] : memref<8x256xf32, #tpu.memory_space<vmem>>, vector<8x256xf32>
    %c0_1 = arith.constant 0 : index
    %c0_2 = arith.constant 0 : index
    %1 = vector.load %arg0[%c0_1, %c0_2] : memref<16x32xf32, #tpu.memory_space<vmem>>, vector<16x32xf32>
    %2 = arith.truncf %1 : vector<16x32xf32> to vector<16x32xbf16>
    %c0_3 = arith.constant 0 : index
    %c0_4 = arith.constant 0 : index
    %3 = vector.load %arg1[%c0_3, %c0_4] : memref<32x256xbf16, #tpu.memory_space<vmem>>, vector<32x256xbf16>
    %cst = arith.constant dense<0.000000e+00> : vector<16x256xf32>
    %4 = tpu.matmul %2, %3, %cst {dimension_numbers = #tpu.dot_dimension_numbers<[1], [0], [0], [1], [0, 0, 1, 1], [], []>} : vector<16x32xbf16>, vector<32x256xbf16>, vector<16x256xf32> -> vector<16x256xf32>
    %5 = vector.extract_strided_slice %0 {offsets = [0, 0], sizes = [1, 256], strides = [1, 1]} : vector<8x256xf32> to vector<1x256xf32>
    %6 = vector.broadcast %5 : vector<1x256xf32> to vector<16x256xf32>
    %7 = arith.addf %4, %6 : vector<16x256xf32>
    %cst_5 = arith.constant 0.000000e+00 : f32
    %8 = vector.broadcast %cst_5 : f32 to vector<16x256xf32>
    %9 = arith.maximumf %7, %8 : vector<16x256xf32>
    %10 = arith.truncf %9 : vector<16x256xf32> to vector<16x256xbf16>
    %c0_6 = arith.constant 0 : index
    %c0_7 = arith.constant 0 : index
    %c0_8 = arith.constant 0 : index
    %11 = vector.load %arg2[%c0_6, %c0_7, %c0_8] : memref<6x256x256xbf16, #tpu.memory_space<vmem>>, vector<1x256x256xbf16>
    %12 = vector.shape_cast %11 : vector<1x256x256xbf16> to vector<256x256xbf16>
    %cst_9 = arith.constant dense<0.000000e+00> : vector<16x256xf32>
    %13 = tpu.matmul %10, %12, %cst_9 {dimension_numbers = #tpu.dot_dimension_numbers<[1], [0], [0], [1], [0, 0, 1, 1], [], []>} : vector<16x256xbf16>, vector<256x256xbf16>, vector<16x256xf32> -> vector<16x256xf32>
    %14 = vector.extract_strided_slice %0 {offsets = [1, 0], sizes = [1, 256], strides = [1, 1]} : vector<8x256xf32> to vector<1x256xf32>
    %15 = vector.broadcast %14 : vector<1x256xf32> to vector<16x256xf32>
    %16 = arith.addf %13, %15 : vector<16x256xf32>
    %cst_10 = arith.constant 0.000000e+00 : f32
    %17 = vector.broadcast %cst_10 : f32 to vector<16x256xf32>
    %18 = arith.maximumf %16, %17 : vector<16x256xf32>
    %19 = arith.truncf %18 : vector<16x256xf32> to vector<16x256xbf16>
    %c1 = arith.constant 1 : index
    %c0_11 = arith.constant 0 : index
    %c0_12 = arith.constant 0 : index
    %20 = vector.load %arg2[%c1, %c0_11, %c0_12] : memref<6x256x256xbf16, #tpu.memory_space<vmem>>, vector<1x256x256xbf16>
    %21 = vector.shape_cast %20 : vector<1x256x256xbf16> to vector<256x256xbf16>
    %cst_13 = arith.constant dense<0.000000e+00> : vector<16x256xf32>
    %22 = tpu.matmul %19, %21, %cst_13 {dimension_numbers = #tpu.dot_dimension_numbers<[1], [0], [0], [1], [0, 0, 1, 1], [], []>} : vector<16x256xbf16>, vector<256x256xbf16>, vector<16x256xf32> -> vector<16x256xf32>
    %23 = vector.extract_strided_slice %0 {offsets = [4, 0], sizes = [1, 256], strides = [1, 1]} : vector<8x256xf32> to vector<1x256xf32>
    %24 = vector.broadcast %23 : vector<1x256xf32> to vector<16x256xf32>
    %25 = arith.addf %22, %24 : vector<16x256xf32>
    %cst_14 = arith.constant 0.000000e+00 : f32
    %26 = vector.broadcast %cst_14 : f32 to vector<16x256xf32>
    %27 = arith.maximumf %25, %26 : vector<16x256xf32>
    %28 = arith.addf %9, %27 : vector<16x256xf32>
    %29 = arith.truncf %28 : vector<16x256xf32> to vector<16x256xbf16>
    %c2 = arith.constant 2 : index
    %c0_15 = arith.constant 0 : index
    %c0_16 = arith.constant 0 : index
    %30 = vector.load %arg2[%c2, %c0_15, %c0_16] : memref<6x256x256xbf16, #tpu.memory_space<vmem>>, vector<1x256x256xbf16>
    %31 = vector.shape_cast %30 : vector<1x256x256xbf16> to vector<256x256xbf16>
    %cst_17 = arith.constant dense<0.000000e+00> : vector<16x256xf32>
    %32 = tpu.matmul %29, %31, %cst_17 {dimension_numbers = #tpu.dot_dimension_numbers<[1], [0], [0], [1], [0, 0, 1, 1], [], []>} : vector<16x256xbf16>, vector<256x256xbf16>, vector<16x256xf32> -> vector<16x256xf32>
    %33 = vector.extract_strided_slice %0 {offsets = [2, 0], sizes = [1, 256], strides = [1, 1]} : vector<8x256xf32> to vector<1x256xf32>
    %34 = vector.broadcast %33 : vector<1x256xf32> to vector<16x256xf32>
    %35 = arith.addf %32, %34 : vector<16x256xf32>
    %cst_18 = arith.constant 0.000000e+00 : f32
    %36 = vector.broadcast %cst_18 : f32 to vector<16x256xf32>
    %37 = arith.maximumf %35, %36 : vector<16x256xf32>
    %38 = arith.truncf %37 : vector<16x256xf32> to vector<16x256xbf16>
    %c3 = arith.constant 3 : index
    %c0_19 = arith.constant 0 : index
    %c0_20 = arith.constant 0 : index
    %39 = vector.load %arg2[%c3, %c0_19, %c0_20] : memref<6x256x256xbf16, #tpu.memory_space<vmem>>, vector<1x256x256xbf16>
    %40 = vector.shape_cast %39 : vector<1x256x256xbf16> to vector<256x256xbf16>
    %cst_21 = arith.constant dense<0.000000e+00> : vector<16x256xf32>
    %41 = tpu.matmul %38, %40, %cst_21 {dimension_numbers = #tpu.dot_dimension_numbers<[1], [0], [0], [1], [0, 0, 1, 1], [], []>} : vector<16x256xbf16>, vector<256x256xbf16>, vector<16x256xf32> -> vector<16x256xf32>
    %42 = vector.extract_strided_slice %0 {offsets = [5, 0], sizes = [1, 256], strides = [1, 1]} : vector<8x256xf32> to vector<1x256xf32>
    %43 = vector.broadcast %42 : vector<1x256xf32> to vector<16x256xf32>
    %44 = arith.addf %41, %43 : vector<16x256xf32>
    %cst_22 = arith.constant 0.000000e+00 : f32
    %45 = vector.broadcast %cst_22 : f32 to vector<16x256xf32>
    %46 = arith.maximumf %44, %45 : vector<16x256xf32>
    %47 = arith.addf %28, %46 : vector<16x256xf32>
    %48 = arith.truncf %47 : vector<16x256xf32> to vector<16x256xbf16>
    %c4 = arith.constant 4 : index
    %c0_23 = arith.constant 0 : index
    %c0_24 = arith.constant 0 : index
    %49 = vector.load %arg2[%c4, %c0_23, %c0_24] : memref<6x256x256xbf16, #tpu.memory_space<vmem>>, vector<1x256x256xbf16>
    %50 = vector.shape_cast %49 : vector<1x256x256xbf16> to vector<256x256xbf16>
    %cst_25 = arith.constant dense<0.000000e+00> : vector<16x256xf32>
    %51 = tpu.matmul %48, %50, %cst_25 {dimension_numbers = #tpu.dot_dimension_numbers<[1], [0], [0], [1], [0, 0, 1, 1], [], []>} : vector<16x256xbf16>, vector<256x256xbf16>, vector<16x256xf32> -> vector<16x256xf32>
    %52 = vector.extract_strided_slice %0 {offsets = [3, 0], sizes = [1, 256], strides = [1, 1]} : vector<8x256xf32> to vector<1x256xf32>
    %53 = vector.broadcast %52 : vector<1x256xf32> to vector<16x256xf32>
    %54 = arith.addf %51, %53 : vector<16x256xf32>
    %cst_26 = arith.constant 0.000000e+00 : f32
    %55 = vector.broadcast %cst_26 : f32 to vector<16x256xf32>
    %56 = arith.maximumf %54, %55 : vector<16x256xf32>
    %57 = arith.truncf %56 : vector<16x256xf32> to vector<16x256xbf16>
    %c5 = arith.constant 5 : index
    %c0_27 = arith.constant 0 : index
    %c0_28 = arith.constant 0 : index
    %58 = vector.load %arg2[%c5, %c0_27, %c0_28] : memref<6x256x256xbf16, #tpu.memory_space<vmem>>, vector<1x256x256xbf16>
    %59 = vector.shape_cast %58 : vector<1x256x256xbf16> to vector<256x256xbf16>
    %cst_29 = arith.constant dense<0.000000e+00> : vector<16x256xf32>
    %60 = tpu.matmul %57, %59, %cst_29 {dimension_numbers = #tpu.dot_dimension_numbers<[1], [0], [0], [1], [0, 0, 1, 1], [], []>} : vector<16x256xbf16>, vector<256x256xbf16>, vector<16x256xf32> -> vector<16x256xf32>
    %61 = vector.extract_strided_slice %0 {offsets = [6, 0], sizes = [1, 256], strides = [1, 1]} : vector<8x256xf32> to vector<1x256xf32>
    %62 = vector.broadcast %61 : vector<1x256xf32> to vector<16x256xf32>
    %63 = arith.addf %60, %62 : vector<16x256xf32>
    %cst_30 = arith.constant 0.000000e+00 : f32
    %64 = vector.broadcast %cst_30 : f32 to vector<16x256xf32>
    %65 = arith.maximumf %63, %64 : vector<16x256xf32>
    %66 = arith.addf %47, %65 : vector<16x256xf32>
    %67 = arith.truncf %66 : vector<16x256xf32> to vector<16x256xbf16>
    %c0_31 = arith.constant 0 : index
    %c0_32 = arith.constant 0 : index
    %68 = vector.load %arg3[%c0_31, %c0_32] : memref<256x128xbf16, #tpu.memory_space<vmem>>, vector<256x128xbf16>
    %cst_33 = arith.constant dense<0.000000e+00> : vector<16x128xf32>
    %69 = tpu.matmul %67, %68, %cst_33 {dimension_numbers = #tpu.dot_dimension_numbers<[1], [0], [0], [1], [0, 0, 1, 1], [], []>} : vector<16x256xbf16>, vector<256x128xbf16>, vector<16x128xf32> -> vector<16x128xf32>
    %70 = vector.extract_strided_slice %0 {offsets = [7, 0], sizes = [1, 128], strides = [1, 1]} : vector<8x256xf32> to vector<1x128xf32>
    %71 = vector.broadcast %70 : vector<1x128xf32> to vector<16x128xf32>
    %72 = arith.addf %69, %71 : vector<16x128xf32>
    %c0_34 = arith.constant 0 : index
    %c0_35 = arith.constant 0 : index
    %73 = vector.load %arg5[%c0_34, %c0_35] : memref<16x128xf32, #tpu.memory_space<vmem>>, vector<16x128xf32>
    tpu.vector_store %arg5[%c0_34, %c0_35], %72 {strides = array<i32>} : memref<16x128xf32, #tpu.memory_space<vmem>>, vector<16x128xf32>,
    return
  }
}

</mosaic_0001>

<bundles_post_ra>
// kernel: tpu_custom_call.1
= control target key start
LH: loop header
LB: loop body
LE: loop exit
PB: predicated region body
PF: predicated region fallthrough
CT: control target
= control target key end

     0   :  { %10 = vsyncpa [#allocation3], 0  ;;  %s3281_s0 = inlined_call_operand.hbm [shape: f32[16,32], index: 0, kind: input, shape index: {}]   ;;  %s3282_s1 = inlined_call_operand.hbm [shape: bf16[32,256], index: 1, kind: input, shape index: {}]   ;;  %s3283_s2 = inlined_call_operand.hbm [shape: bf16[6,256,256], index: 2, kind: input, shape index: {}]   ;;  %s3284_s3 = inlined_call_operand.hbm [shape: bf16[256,128], index: 3, kind: input, shape index: {}]   ;;  %s3285_s4 = inlined_call_operand.hbm [shape: f32[8,256], index: 4, kind: input, shape index: {}]   ;;  %s3286_s5 = inlined_call_operand.hbm [shape: f32[16,128], index: 5, kind: output, shape index: {}]  }
   0x1   :  { %11 = vsyncpa [#allocation6], 0 }
   0x2   :  { %12 = vsyncpa [#allocation9], 0 }
   0x3   :  { %13 = vsyncpa [#allocation4], 0  ;;  %s31_s20 = sshll.u32 %s3282_s1, 4  ;;  %s3126_s21 = smov [#allocation5]   ;;  %s32_s20 = int_to_ptr.hbm [resolvable:$true] %s31_s20 }
   0x4   :  { %s33_s22 = sshll.u32 %s3126_s21, 4  ;;  %s57_s25 = sshll.u32 %s3284_s3, 4  ;;  %s34_s22 = int_to_ptr.vmem [resolvable:$true] %s33_s22  ;;  %s58_s25 = int_to_ptr.hbm [resolvable:$true] %s57_s25 }
   0x5   :  { %s3127_s26 = smov 128   ;;  %s3128_s27 = smov 8  }
   0x6   :  { %39 = dma.hbm_to_vmem [thread:$0]  %s32_s20, 512, %s34_s22, [#allocation6], %s3127_s26, %s3127_s26, %s3128_s27  }
   0x7   :  { %s3129_s28 = smov [#allocation8]   ;;  %s3130_s30 = smov 64  }
   0x8   :  { %s59_s29 = sshll.u32 %s3129_s28, 4  ;;  %s3131_s1 = smov 4   ;;  %s60_s29 = int_to_ptr.vmem [resolvable:$true] %s59_s29 }
   0x9   :  { %65 = dma.hbm_to_vmem [thread:$0]  %s58_s25, 2048, %s60_s29, [#allocation9], %s3130_s30, %s3130_s30, %s3131_s1  }
   0xa   :  { %s18_s8 = sshll.u32 %s3281_s0, 4  ;;  %s3132_s9 = smov [#allocation2]   ;;  %s19_s8 = int_to_ptr.hbm [resolvable:$true] %s18_s8 }
   0xb   :  { %s20_s3 = sshll.u32 %s3132_s9, 4  ;;  %s44_s12 = sshll.u32 %s3283_s2, 4  ;;  %s21_s3 = int_to_ptr.vmem [resolvable:$true] %s20_s3  ;;  %s45_s12 = int_to_ptr.hbm [resolvable:$true] %s44_s12 }
   0xc   :  { %26 = dma.hbm_to_vmem [thread:$0]  %s19_s8, 256, %s21_s3, [#allocation3], %s3127_s26, %s3127_s26, %s3128_s27  }
   0xd   :  { %s3133_s13 = smov [#allocation7]   ;;  %s71_s17 = sshll.u32 %s3285_s4, 4  ;;  %s72_s17 = int_to_ptr.hbm [resolvable:$true] %s71_s17 }
   0xe   :  { %s46_s14 = sshll.u32 %s3133_s13, 4  ;;  %s3134_s0 = smov [#allocation10]   ;;  %s47_s14 = int_to_ptr.vmem [resolvable:$true] %s46_s14 }
   0xf   :  { %52 = dma.hbm_to_vmem [thread:$0]  %s45_s12, 24576, %s47_s14, [#allocation6], %s3127_s26, %s3127_s26, %s3128_s27  }
  0x10   :  { %s73_s18 = sshll.u32 %s3134_s0, 4  ;;  %s74_s18 = int_to_ptr.vmem [resolvable:$true] %s73_s18 }
  0x11   :  { %76 = dma.hbm_to_vmem [thread:$0]  %s72_s17, 256, %s74_s18, [#allocation9]  }
  0x12   :  { %3118 = dma.done.wait [#allocation3], 256  }
  0x13   :  { %3119 = vsyncadd [#allocation3], 4294967040 }
  0x14   :  { %3120 = dma.done.wait [#allocation6], 25088  }
  0x15   :  { %3121 = vsyncadd [#allocation6], 4294942208 }
  0x16   :  { %3122 = dma.done.wait [#allocation9], 2304  }
  0x17   :  { %3123 = vsyncadd [#allocation9], 4294964992  ;;  %v1910_v0 = vld [vmem:[#allocation5 + $0x10] sm:$0xf]  ;;  %v2753_v1 = vld [vmem:[#allocation5 + $0x14] sm:$0xf0] }
  0x18   :  { %v2752_v2 = vld [vmem:[#allocation5 + $0x14] sm:$0xf]  ;;  %v1911_v3 = vor.u32 %v2753_v1, %v1910_v0  ;;  %v1912_v4 = vld [vmem:[#allocation5 + $0x18] sm:$0xf0]  ;;  %v1902_v5 = vld [vmem:[#allocation5] sm:$0xf] }
  0x19   :  { %v2751_v6 = vld [vmem:[#allocation5 + $0x4] sm:$0xf0]  ;;  %v1915_v7 = vor.u32 %v2752_v2, %v1912_v4  ;;  %v2750_v8 = vld [vmem:[#allocation5 + $0x4] sm:$0xf]  ;;  %v1904_v9 = vld [vmem:[#allocation5 + $0x8] sm:$0xf0] }
  0x1a   :  { %v100_v10 = vld [vmem:[#allocation2] sm:$0xff]  ;;  %139 = vmatpush.bf16.msra.mxu0 %v1911_v3  ;;  %v1903_v11 = vor.u32 %v2751_v6, %v1902_v5  ;;  %v101_v12 = vld [vmem:[#allocation2 + $0x8] sm:$0xff]  ;;  %vm129_vm0 = vcmask 261120   ;;  %v1907_v15 = vor.u32 %v2750_v8, %v1904_v9  ;;  %v1968_v27 = vld [vmem:[#allocation7 + $0x60] sm:$0xf]  ;;  %s3135_s2 = smov [#allocation11]  }
  0x1b   :  { %v1976_v13 = vld [vmem:[#allocation7 + $0x70] sm:$0xf]  ;;  %v2769_v14 = vld [vmem:[#allocation7 + $0x74] sm:$0xf0]  ;;  %153 = vmatpush.bf16.msra.mxu1 %v1915_v7  ;;  %v2768_v19 = vld [vmem:[#allocation7 + $0x74] sm:$0xf]  ;;  %v102_v24 = vpack.c.bf16 %v101_v12, %v100_v10 }
  0x1c   :  { %v1977_v16 = vor.u32 %v2769_v14, %v1976_v13  ;;  %v2040_v17 = vld [vmem:[#allocation7 + $0xf0] sm:$0xf]  ;;  %v2785_v18 = vld [vmem:[#allocation7 + $0xf4] sm:$0xf0]  ;;  %v1978_v21 = vld [vmem:[#allocation7 + $0x78] sm:$0xf0] }
  0x1d   :  { %v2041_v20 = vor.u32 %v2785_v18, %v2040_v17  ;;  %v2784_v22 = vld [vmem:[#allocation7 + $0xf4] sm:$0xf]  ;;  %v2042_v23 = vld [vmem:[#allocation7 + $0xf8] sm:$0xf0]  ;;  %v1981_v25 = vor.u32 %v2768_v19, %v1978_v21  ;;  %v2767_v28 = vld [vmem:[#allocation7 + $0x64] sm:$0xf0] }
  0x1e   :  { %361 = vmatpush.bf16.msra.mxu2 %v1977_v16  ;;  %v2045_v26 = vor.u32 %v2784_v22, %v2042_v23  ;;  %v2032_v29 = vld [vmem:[#allocation7 + $0xe0] sm:$0xf]  ;;  %140 = vmatpush.bf16.msra.mxu0 %v1903_v11  ;;  %v1969_v30 = vor.u32 %v2767_v28, %v1968_v27  ;;  %v2783_v31 = vld [vmem:[#allocation7 + $0xe4] sm:$0xf0]  ;;  %v2766_v32 = vld [vmem:[#allocation7 + $0x64] sm:$0xf] }
  0x1f   :  { %375 = vmatpush.bf16.msra.mxu3 %v2041_v20  ;;  %v1970_v33 = vld [vmem:[#allocation7 + $0x68] sm:$0xf0]  ;;  %154 = vmatpush.bf16.msra.mxu1 %v1907_v15  ;;  %v2033_v34 = vor.u32 %v2783_v31, %v2032_v29  ;;  %v2782_v36 = vld [vmem:[#allocation7 + $0xe4] sm:$0xf]  ;;  %v1960_v38 = vld [vmem:[#allocation7 + $0x50] sm:$0xf] }
  0x20   :  { %v1973_v35 = vor.u32 %v2766_v32, %v1970_v33  ;;  %v2034_v37 = vld [vmem:[#allocation7 + $0xe8] sm:$0xf0]  ;;  %v2765_v40 = vld [vmem:[#allocation7 + $0x54] sm:$0xf0]  ;;  %v2024_v41 = vld [vmem:[#allocation7 + $0xd0] sm:$0xf] }
  0x21   :  { %v2037_v39 = vor.u32 %v2782_v36, %v2034_v37  ;;  %v2781_v42 = vld [vmem:[#allocation7 + $0xd4] sm:$0xf0]  ;;  %1916 = vmatmul.msk.bf16.vlgmr.msra.gmra.mxu0 %vm129_vm0, %v102_v24  ;;  %v1961_v43 = vor.u32 %v2765_v40, %v1960_v38  ;;  %v2764_v44 = vld [vmem:[#allocation7 + $0x54] sm:$0xf]  ;;  %v1962_v45 = vld [vmem:[#allocation7 + $0x58] sm:$0xf0] }
  0x22   :  { %389 = vmatpush.bf16.msrb.mxu0 %v1981_v25  ;;  %362 = vmatpush.bf16.msra.mxu2 %v1969_v30  ;;  %v2780_v46 = vld [vmem:[#allocation7 + $0xd4] sm:$0xf]  ;;  %v2025_v47 = vor.u32 %v2781_v42, %v2024_v41  ;;  %v2026_v48 = vld [vmem:[#allocation7 + $0xd8] sm:$0xf0]  ;;  %v1952_v49 = vld [vmem:[#allocation7 + $0x40] sm:$0xf]  ;;  %v1965_v51 = vor.u32 %v2764_v44, %v1962_v45 }
  0x23   :  { %403 = vmatpush.bf16.msrb.mxu1 %v2045_v26  ;;  %376 = vmatpush.bf16.msra.mxu3 %v2033_v34  ;;  %v2763_v50 = vld [vmem:[#allocation7 + $0x44] sm:$0xf0]  ;;  %v2016_v52 = vld [vmem:[#allocation7 + $0xc0] sm:$0xf]  ;;  %v2029_v54 = vor.u32 %v2780_v46, %v2026_v48  ;;  %v2762_v55 = vld [vmem:[#allocation7 + $0x44] sm:$0xf] }
  0x24   :  { %1917 = vmatmul.msk.bf16.vlgmr.msra.gmra.mxu1 %vm129_vm0, %v102_v24  ;;  %v2779_v53 = vld [vmem:[#allocation7 + $0xc4] sm:$0xf0]  ;;  %v1954_v56 = vld [vmem:[#allocation7 + $0x48] sm:$0xf0]  ;;  %v1953_v57 = vor.u32 %v2763_v50, %v1952_v49  ;;  %v2778_v58 = vld [vmem:[#allocation7 + $0xc4] sm:$0xf] }
  0x25   :  { %v2018_v59 = vld [vmem:[#allocation7 + $0xc8] sm:$0xf0]  ;;  %v2017_v60 = vor.u32 %v2779_v53, %v2016_v52  ;;  %v1957_v61 = vor.u32 %v2762_v55, %v1954_v56  ;;  %v1944_v63 = vld [vmem:[#allocation7 + $0x30] sm:$0xf]  ;;  %v2761_v0 = vld [vmem:[#allocation7 + $0x34] sm:$0xf0] }
  0x26   :  { %390 = vmatpush.bf16.msrb.mxu0 %v1973_v35  ;;  %363 = vmatpush.bf16.msra.mxu2 %v1961_v43  ;;  %v2021_v62 = vor.u32 %v2778_v58, %v2018_v59  ;;  %v2008_v1 = vld [vmem:[#allocation7 + $0xb0] sm:$0xf]  ;;  %v1945_v2 = vor.u32 %v2761_v0, %v1944_v63  ;;  %v2777_v3 = vld [vmem:[#allocation7 + $0xb4] sm:$0xf0]  ;;  %v2760_v4 = vld [vmem:[#allocation7 + $0x34] sm:$0xf] }
  0x27   :  { %404 = vmatpush.bf16.msrb.mxu1 %v2037_v39  ;;  %377 = vmatpush.bf16.msra.mxu3 %v2025_v47  ;;  %v1946_v5 = vld [vmem:[#allocation7 + $0x38] sm:$0xf0]  ;;  %v2009_v6 = vor.u32 %v2777_v3, %v2008_v1  ;;  %v2776_v8 = vld [vmem:[#allocation7 + $0xb4] sm:$0xf]  ;;  %v1936_v11 = vld [vmem:[#allocation7 + $0x20] sm:$0xf] }
  0x28   :  { %v1949_v7 = vor.u32 %v2760_v4, %v1946_v5  ;;  %v2010_v9 = vld [vmem:[#allocation7 + $0xb8] sm:$0xf0]  ;;  %v2759_v12 = vld [vmem:[#allocation7 + $0x24] sm:$0xf0]  ;;  %v2000_v14 = vld [vmem:[#allocation7 + $0xa0] sm:$0xf] }
  0x29   :  { %v2013_v10 = vor.u32 %v2776_v8, %v2010_v9  ;;  %v1937_v13 = vor.u32 %v2759_v12, %v1936_v11  ;;  %v2775_v15 = vld [vmem:[#allocation7 + $0xa4] sm:$0xf0]  ;;  %v2758_v16 = vld [vmem:[#allocation7 + $0x24] sm:$0xf]  ;;  %v1938_v18 = vld [vmem:[#allocation7 + $0x28] sm:$0xf0] }
  0x2a   :  { %391 = vmatpush.bf16.msrb.mxu0 %v1965_v51  ;;  %364 = vmatpush.bf16.msra.mxu2 %v1953_v57  ;;  %v2001_v17 = vor.u32 %v2775_v15, %v2000_v14  ;;  %v2774_v19 = vld [vmem:[#allocation7 + $0xa4] sm:$0xf]  ;;  %v2002_v20 = vld [vmem:[#allocation7 + $0xa8] sm:$0xf0]  ;;  %v1941_v21 = vor.u32 %v2758_v16, %v1938_v18  ;;  %v1928_v23 = vld [vmem:[#allocation7 + $0x10] sm:$0xf] }
  0x2b   :  { %405 = vmatpush.bf16.msrb.mxu1 %v2029_v54  ;;  %378 = vmatpush.bf16.msra.mxu3 %v2017_v60  ;;  %v2005_v22 = vor.u32 %v2774_v19, %v2002_v20  ;;  %v2757_v24 = vld [vmem:[#allocation7 + $0x14] sm:$0xf0]  ;;  %v1992_v25 = vld [vmem:[#allocation7 + $0x90] sm:$0xf]  ;;  %v2756_v28 = vld [vmem:[#allocation7 + $0x14] sm:$0xf] }
  0x2c   :  { %v1929_v26 = vor.u32 %v2757_v24, %v1928_v23  ;;  %v2773_v27 = vld [vmem:[#allocation7 + $0x94] sm:$0xf0]  ;;  %v1930_v29 = vld [vmem:[#allocation7 + $0x18] sm:$0xf0]  ;;  %v2772_v32 = vld [vmem:[#allocation7 + $0x94] sm:$0xf] }
  0x2d   :  { %v1993_v30 = vor.u32 %v2773_v27, %v1992_v25  ;;  %v1933_v31 = vor.u32 %v2756_v28, %v1930_v29  ;;  %v1994_v33 = vld [vmem:[#allocation7 + $0x98] sm:$0xf0]  ;;  %v1920_v35 = vld [vmem:[#allocation7] sm:$0xf]  ;;  %v2755_v36 = vld [vmem:[#allocation7 + $0x4] sm:$0xf0] }
  0x2e   :  { %392 = vmatpush.bf16.msrb.mxu0 %v1957_v61  ;;  %365 = vmatpush.bf16.msra.mxu2 %v1945_v2  ;;  %v1997_v34 = vor.u32 %v2772_v32, %v1994_v33  ;;  %v1984_v37 = vld [vmem:[#allocation7 + $0x80] sm:$0xf]  ;;  %v1921_v38 = vor.u32 %v2755_v36, %v1920_v35  ;;  %v2771_v39 = vld [vmem:[#allocation7 + $0x84] sm:$0xf0]  ;;  %v2754_v40 = vld [vmem:[#allocation7 + $0x4] sm:$0xf] }
  0x2f   :  { %406 = vmatpush.bf16.msrb.mxu1 %v2021_v62  ;;  %379 = vmatpush.bf16.msra.mxu3 %v2009_v6  ;;  %v1922_v41 = vld [vmem:[#allocation7 + $0x8] sm:$0xf0]  ;;  %v1985_v42 = vor.u32 %v2771_v39, %v1984_v37  ;;  %v2770_v44 = vld [vmem:[#allocation7 + $0x84] sm:$0xf]  ;;  %v2168_v47 = vld [vmem:[#allocation7 + $0x1f0] sm:$0xf] }
  0x30   :  { %v1925_v43 = vor.u32 %v2754_v40, %v1922_v41  ;;  %v1986_v45 = vld [vmem:[#allocation7 + $0x88] sm:$0xf0]  ;;  %v2817_v48 = vld [vmem:[#allocation7 + $0x1f4] sm:$0xf0]  ;;  %v2816_v49 = vld [vmem:[#allocation7 + $0x1f4] sm:$0xf] }
  0x31   :  { %v1989_v46 = vor.u32 %v2770_v44, %v1986_v45  ;;  %v2169_v50 = vor.u32 %v2817_v48, %v2168_v47  ;;  %v2170_v51 = vld [vmem:[#allocation7 + $0x1f8] sm:$0xf0]  ;;  %v2160_v52 = vld [vmem:[#allocation7 + $0x1e0] sm:$0xf]  ;;  %v2815_v53 = vld [vmem:[#allocation7 + $0x1e4] sm:$0xf0] }
  0x32   :  { %393 = vmatpush.bf16.msrb.mxu0 %v1949_v7  ;;  %366 = vmatpush.bf16.msra.mxu2 %v1937_v13  ;;  %v2173_v54 = vor.u32 %v2816_v49, %v2170_v51  ;;  %v2814_v55 = vld [vmem:[#allocation7 + $0x1e4] sm:$0xf]  ;;  %v2162_v56 = vld [vmem:[#allocation7 + $0x1e8] sm:$0xf0]  ;;  %v2104_v57 = vld [vmem:[#allocation7 + $0x170] sm:$0xf]  ;;  %v2161_v58 = vor.u32 %v2815_v53, %v2160_v52 }
  0x33   :  { %407 = vmatpush.bf16.msrb.mxu1 %v2013_v10  ;;  %380 = vmatpush.bf16.msra.mxu3 %v2001_v17  ;;  %v2801_v59 = vld [vmem:[#allocation7 + $0x174] sm:$0xf0]  ;;  %v2800_v60 = vld [vmem:[#allocation7 + $0x174] sm:$0xf]  ;;  %v2106_v61 = vld [vmem:[#allocation7 + $0x178] sm:$0xf0]  ;;  %v2165_v62 = vor.u32 %v2814_v55, %v2162_v56 }
  0x34   :  { %v2105_v63 = vor.u32 %v2801_v59, %v2104_v57  ;;  %v2109_v0 = vor.u32 %v2800_v60, %v2106_v61  ;;  %v2152_v1 = vld [vmem:[#allocation7 + $0x1d0] sm:$0xf]  ;;  %v2813_v2 = vld [vmem:[#allocation7 + $0x1d4] sm:$0xf0]  ;;  %v2812_v3 = vld [vmem:[#allocation7 + $0x1d4] sm:$0xf] }
  0x35   :  { %v2154_v4 = vld [vmem:[#allocation7 + $0x1d8] sm:$0xf0]  ;;  %v2096_v5 = vld [vmem:[#allocation7 + $0x160] sm:$0xf]  ;;  %v2799_v6 = vld [vmem:[#allocation7 + $0x164] sm:$0xf0]  ;;  %v2153_v10 = vor.u32 %v2813_v2, %v2152_v1 }
  0x36   :  { %394 = vmatpush.bf16.msrb.mxu0 %v1941_v21  ;;  %367 = vmatpush.bf16.msra.mxu2 %v1929_v26  ;;  %v2097_v7 = vor.u32 %v2799_v6, %v2096_v5  ;;  %v2798_v8 = vld [vmem:[#allocation7 + $0x164] sm:$0xf]  ;;  %v2098_v9 = vld [vmem:[#allocation7 + $0x168] sm:$0xf0]  ;;  %v2157_v12 = vor.u32 %v2812_v3, %v2154_v4  ;;  %v2144_v13 = vld [vmem:[#allocation7 + $0x1c0] sm:$0xf] }
  0x37   :  { %408 = vmatpush.bf16.msrb.mxu1 %v2005_v22  ;;  %381 = vmatpush.bf16.msra.mxu3 %v1993_v30  ;;  %v2101_v11 = vor.u32 %v2798_v8, %v2098_v9  ;;  %v2811_v14 = vld [vmem:[#allocation7 + $0x1c4] sm:$0xf0]  ;;  %v2810_v15 = vld [vmem:[#allocation7 + $0x1c4] sm:$0xf]  ;;  %v2146_v16 = vld [vmem:[#allocation7 + $0x1c8] sm:$0xf0] }
  0x38   :  { %v2145_v17 = vor.u32 %v2811_v14, %v2144_v13  ;;  %v2149_v18 = vor.u32 %v2810_v15, %v2146_v16  ;;  %v3192_v19 = vld [vmem:[#allocation10] sm:$0xff]  ;;  %v3194_v21 = vld [vmem:[#allocation10 + $0x8] sm:$0xff]  ;;  %v2088_v37 = vld [vmem:[#allocation7 + $0x150] sm:$0xf]  ;;  %s1883_s4 = sshll.u32 %s3135_s2, 4  ;;  %s1885_s21 = sshll.u32 %s3286_s5, 4  ;;  %s1884_s4 = int_to_ptr.vmem [resolvable:$true] %s1883_s4  ;;  %s1886_s21 = int_to_ptr.hbm [resolvable:$true] %s1885_s21 }
  0x39   :  { %v107_v23 = vperm.slane %v3192_v19, 0  ;;  %v108_v24 = vperm.slane %v3194_v21, 0  ;;  %v2796_v39 = vld [vmem:[#allocation7 + $0x154] sm:$0xf]  ;;  %v2090_v41 = vld [vmem:[#allocation7 + $0x158] sm:$0xf0] }
  0x3a   :  { %395 = vmatpush.bf16.msrb.mxu0 %v1933_v31  ;;  %368 = vmatpush.bf16.msra.mxu2 %v1921_v38  ;;  %v2797_v38 = vld [vmem:[#allocation7 + $0x154] sm:$0xf0]  ;;  %v2808_v45 = vld [vmem:[#allocation7 + $0x1b4] sm:$0xf]  ;;  %v2138_v47 = vld [vmem:[#allocation7 + $0x1b8] sm:$0xf0] }
  0x3b   :  { %409 = vmatpush.bf16.msrb.mxu1 %v1997_v34  ;;  %382 = vmatpush.bf16.msra.mxu3 %v1985_v42  ;;  %v2089_v40 = vor.u32 %v2797_v38, %v2088_v37  ;;  %v2093_v42 = vor.u32 %v2796_v39, %v2090_v41  ;;  %v2809_v44 = vld [vmem:[#allocation7 + $0x1b4] sm:$0xf0]  ;;  %v2141_v48 = vor.u32 %v2808_v45, %v2138_v47  ;;  %v2080_v49 = vld [vmem:[#allocation7 + $0x140] sm:$0xf]  ;;  %v2794_v51 = vld [vmem:[#allocation7 + $0x144] sm:$0xf] }
  0x3c   :  { %v2082_v53 = vld [vmem:[#allocation7 + $0x148] sm:$0xf0]  ;;  %v2128_v55 = vld [vmem:[#allocation7 + $0x1a0] sm:$0xf]  ;;  %v2807_v56 = vld [vmem:[#allocation7 + $0x1a4] sm:$0xf0] }
  0x3d   :  { %v2806_v57 = vld [vmem:[#allocation7 + $0x1a4] sm:$0xf]  ;;  %v2130_v59 = vld [vmem:[#allocation7 + $0x1a8] sm:$0xf0]  ;;  %v2072_v61 = vld [vmem:[#allocation7 + $0x130] sm:$0xf] }
  0x3e   :  { %396 = vmatpush.bf16.msrb.mxu0 %v1925_v43  ;;  %618 = vmatpush.bf16.msrb.mxu2 %v2105_v63  ;;  %v2136_v43 = vld [vmem:[#allocation7 + $0x1b0] sm:$0xf]  ;;  %v2133_v60 = vor.u32 %v2806_v57, %v2130_v59  ;;  %v2792_v63 = vld [vmem:[#allocation7 + $0x134] sm:$0xf]  ;;  %v2074_v1 = vld [vmem:[#allocation7 + $0x138] sm:$0xf0] }
  0x3f   :  { %410 = vmatpush.bf16.msrb.mxu1 %v1989_v46  ;;  %632 = vmatpush.bf16.msrb.mxu3 %v2169_v50  ;;  %v2137_v46 = vor.u32 %v2809_v44, %v2136_v43  ;;  %v2795_v50 = vld [vmem:[#allocation7 + $0x144] sm:$0xf0]  ;;  %v2077_v2 = vor.u32 %v2792_v63, %v2074_v1  ;;  %v2120_v3 = vld [vmem:[#allocation7 + $0x190] sm:$0xf]  ;;  %v2805_v4 = vld [vmem:[#allocation7 + $0x194] sm:$0xf0] }
  0x40   :  { %v2081_v52 = vor.u32 %v2795_v50, %v2080_v49  ;;  %v2804_v5 = vld [vmem:[#allocation7 + $0x194] sm:$0xf]  ;;  %v2121_v6 = vor.u32 %v2805_v4, %v2120_v3  ;;  %v2064_v9 = vld [vmem:[#allocation7 + $0x120] sm:$0xf]  ;;  %v2066_v13 = vld [vmem:[#allocation7 + $0x128] sm:$0xf0] }
  0x41   :  { %v2112_v15 = vld [vmem:[#allocation7 + $0x180] sm:$0xf]  ;;  %v2803_v16 = vld [vmem:[#allocation7 + $0x184] sm:$0xf0]  ;;  %v2786_v39 = vld [vmem:[#allocation7 + $0x104] sm:$0xf] }
  0x42   :  { %646 = vmatpush.bf16.msra.mxu0 %v2109_v0  ;;  %619 = vmatpush.bf16.msrb.mxu2 %v2097_v7  ;;  %v2122_v7 = vld [vmem:[#allocation7 + $0x198] sm:$0xf0]  ;;  %v2048_v37 = vld [vmem:[#allocation7 + $0x100] sm:$0xf]  ;;  %v2787_v38 = vld [vmem:[#allocation7 + $0x104] sm:$0xf0] }
  0x43   :  { %660 = vmatpush.bf16.msra.mxu1 %v2173_v54  ;;  %633 = vmatpush.bf16.msrb.mxu3 %v2161_v58  ;;  %v2085_v54 = vor.u32 %v2794_v51, %v2082_v53  ;;  %v2129_v58 = vor.u32 %v2807_v56, %v2128_v55  ;;  %v2125_v8 = vor.u32 %v2804_v5, %v2122_v7  ;;  %v2050_v41 = vld [vmem:[#allocation7 + $0x108] sm:$0xf0]  ;;  %v2296_v43 = vld [vmem:[#allocation7 + $0x2f0] sm:$0xf]  ;;  %v2849_v44 = vld [vmem:[#allocation7 + $0x2f4] sm:$0xf0] }
  0x44   :  { %v2848_v45 = vld [vmem:[#allocation7 + $0x2f4] sm:$0xf]  ;;  %v2298_v47 = vld [vmem:[#allocation7 + $0x2f8] sm:$0xf0]  ;;  %v2847_v49 = vld [vmem:[#allocation7 + $0x2e4] sm:$0xf0] }
  0x45   :  { %v2301_v50 = vor.u32 %v2848_v45, %v2298_v47  ;;  %v2846_v51 = vld [vmem:[#allocation7 + $0x2e4] sm:$0xf]  ;;  %v200_v56 = vperm.slane %v3194_v21, 1  ;;  %v2274_v47 = vld [vmem:[#allocation7 + $0x2c8] sm:$0xf0] }
  0x46   :  { %647 = vmatpush.bf16.msra.mxu0 %v2101_v11  ;;  %620 = vmatpush.bf16.msrb.mxu2 %v2089_v40  ;;  %v2790_v11 = vld [vmem:[#allocation7 + $0x124] sm:$0xf]  ;;  %v2049_v40 = vor.u32 %v2787_v38, %v2048_v37  ;;  %v2831_v37 = vld [vmem:[#allocation7 + $0x264] sm:$0xf0] }
  0x47   :  { %661 = vmatpush.bf16.msra.mxu1 %v2165_v62  ;;  %634 = vmatpush.bf16.msrb.mxu3 %v2153_v10  ;;  %v2793_v62 = vld [vmem:[#allocation7 + $0x134] sm:$0xf0]  ;;  %v2791_v10 = vld [vmem:[#allocation7 + $0x124] sm:$0xf0]  ;;  %v2069_v14 = vor.u32 %v2790_v11, %v2066_v13  ;;  %v2842_v45 = vld [vmem:[#allocation7 + $0x2c4] sm:$0xf] }
  0x48   :  { %v2073_v0 = vor.u32 %v2793_v62, %v2072_v61 }
  0x4a   :  { %648 = vmatpush.bf16.msra.mxu0 %v2093_v42  ;;  %621 = vmatpush.bf16.msrb.mxu2 %v2081_v52  ;;  %v2053_v42 = vor.u32 %v2786_v39, %v2050_v41  ;;  %v2290_v52 = vld [vmem:[#allocation7 + $0x2e8] sm:$0xf0] }
  0x4b   :  { %662 = vmatpush.bf16.msra.mxu1 %v2157_v12  ;;  %635 = vmatpush.bf16.msrb.mxu3 %v2145_v17  ;;  %v2065_v12 = vor.u32 %v2791_v10, %v2064_v9  ;;  %v2802_v17 = vld [vmem:[#allocation7 + $0x184] sm:$0xf]  ;;  %v2226_v41 = vld [vmem:[#allocation7 + $0x268] sm:$0xf0] }
  0x4e   :  { %649 = vmatpush.bf16.msra.mxu0 %v2085_v54  ;;  %622 = vmatpush.bf16.msrb.mxu2 %v2073_v0  ;;  %v2293_v54 = vor.u32 %v2846_v51, %v2290_v52  ;;  %v2828_v52 = vld [vmem:[#allocation7 + $0x254] sm:$0xf] }
  0x4f   :  { %663 = vmatpush.bf16.msra.mxu1 %v2149_v18  ;;  %636 = vmatpush.bf16.msrb.mxu3 %v2137_v46  ;;  %v2113_v18 = vor.u32 %v2803_v16, %v2112_v15  ;;  %v2297_v46 = vor.u32 %v2849_v44, %v2296_v43  ;;  %v2232_v15 = vld [vmem:[#allocation7 + $0x270] sm:$0xf]  ;;  %v2833_v16 = vld [vmem:[#allocation7 + $0x274] sm:$0xf0]  ;;  %v2272_v43 = vld [vmem:[#allocation7 + $0x2c0] sm:$0xf] }
  0x50   :  { %v2843_v44 = vld [vmem:[#allocation7 + $0x2c4] sm:$0xf0] }
  0x52   :  { %650 = vmatpush.bf16.msra.mxu0 %v2077_v2  ;;  %623 = vmatpush.bf16.msrb.mxu2 %v2065_v12 }
  0x53   :  { %664 = vmatpush.bf16.msra.mxu1 %v2141_v48  ;;  %637 = vmatpush.bf16.msrb.mxu3 %v2129_v58  ;;  %v2288_v48 = vld [vmem:[#allocation7 + $0x2e0] sm:$0xf] }
  0x54   :  { %v2289_v53 = vor.u32 %v2847_v49, %v2288_v48  ;;  %v2277_v48 = vor.u32 %v2842_v45, %v2274_v47  ;;  %v2216_v49 = vld [vmem:[#allocation7 + $0x250] sm:$0xf]  ;;  %v2820_v45 = vld [vmem:[#allocation7 + $0x214] sm:$0xf]  ;;  %v2186_v47 = vld [vmem:[#allocation7 + $0x218] sm:$0xf0] }
  0x56   :  { %651 = vmatpush.bf16.msra.mxu0 %v2069_v14 }
  0x57   :  { %665 = vmatpush.bf16.msra.mxu1 %v2133_v60  ;;  %638 = vmatpush.bf16.msrb.mxu3 %v2121_v6  ;;  %v199_v60 = vperm.slane %v3192_v19, 1 }
  0x5b   :  { %666 = vmatpush.bf16.msra.mxu1 %v2125_v8  ;;  %639 = vmatpush.bf16.msrb.mxu3 %v2113_v18  ;;  %v2233_v18 = vor.u32 %v2833_v16, %v2232_v15  ;;  %v2248_v15 = vld [vmem:[#allocation7 + $0x290] sm:$0xf]  ;;  %v2837_v16 = vld [vmem:[#allocation7 + $0x294] sm:$0xf0] }
  0x9e   :  { %v142_v20 = vpop.f32.mrf.mxu0 }
  0x9f   :  { %v3198_v25 = vadd.f32 %v142_v20, %v107_v23  ;;  %v2114_v20 = vld [vmem:[#allocation7 + $0x188] sm:$0xf0] }
  0xa1   :  { %v156_v22 = vpop.f32.mrf.mxu1  ;;  %v161_v31 = vmax.f32 %v3198_v25, 0.0  ;;  %v2862_v25 = vld [vmem:[#allocation7 + $0x364] sm:$0xf] }
  0xa2   :  { %v3200_v26 = vadd.f32 %v156_v22, %v108_v24  ;;  %v2117_v22 = vor.u32 %v2802_v17, %v2114_v20  ;;  %v2832_v17 = vld [vmem:[#allocation7 + $0x274] sm:$0xf]  ;;  %v2234_v20 = vld [vmem:[#allocation7 + $0x278] sm:$0xf0] }
  0xa4   :  { %v162_v33 = vmax.f32 %v3200_v26, 0.0  ;;  %667 = vmatpush.bf16.msra.mxu1 %v2117_v22  ;;  %v2237_v22 = vor.u32 %v2832_v17, %v2234_v20  ;;  %v2836_v17 = vld [vmem:[#allocation7 + $0x294] sm:$0xf]  ;;  %v2250_v20 = vld [vmem:[#allocation7 + $0x298] sm:$0xf0] }
  0xa6   :  { %v144_v27 = vpop.f32.mrf.mxu0 }
  0xa7   :  { %v3202_v28 = vadd.f32 %v144_v27, %v107_v23  ;;  %v2056_v23 = vld [vmem:[#allocation7 + $0x110] sm:$0xf]  ;;  %v2788_v27 = vld [vmem:[#allocation7 + $0x114] sm:$0xf] }
  0xa9   :  { %v158_v29 = vpop.f32.mrf.mxu1  ;;  %v163_v32 = vmax.f32 %v3202_v28, 0.0  ;;  %v2400_v28 = vld [vmem:[#allocation7 + $0x3c0] sm:$0xf] }
  0xaa   :  { %v3204_v30 = vadd.f32 %v158_v29, %v108_v24  ;;  %v2789_v24 = vld [vmem:[#allocation7 + $0x114] sm:$0xf0] }
  0xab   :  { %v165_v35 = vpack.c.bf16 %v163_v32, %v161_v31  ;;  %v2057_v29 = vor.u32 %v2789_v24, %v2056_v23  ;;  %v2280_v23 = vld [vmem:[#allocation7 + $0x2d0] sm:$0xf]  ;;  %v2845_v24 = vld [vmem:[#allocation7 + $0x2d4] sm:$0xf0] }
  0xac   :  { %v164_v34 = vmax.f32 %v3204_v30, 0.0 }
  0xad   :  { %369 = vmatmul.bf16.vlgmr.msra.gmra.mxu2 %v165_v35  ;;  %397 = vmatmul.bf16.vlgmr.msrb.gmra.mxu0 %v165_v35  ;;  %v2058_v35 = vld [vmem:[#allocation7 + $0x118] sm:$0xf0] }
  0xae   :  { %v166_v36 = vpack.c.bf16 %v164_v34, %v162_v33  ;;  %624 = vmatpush.bf16.msrb.mxu2 %v2057_v29  ;;  %v2281_v29 = vor.u32 %v2845_v24, %v2280_v23  ;;  %v2192_v23 = vld [vmem:[#allocation7 + $0x220] sm:$0xf]  ;;  %v2823_v24 = vld [vmem:[#allocation7 + $0x224] sm:$0xf0] }
  0xb0   :  { %383 = vmatmul.bf16.vlgmr.msra.gmra.mxu3 %v166_v36  ;;  %411 = vmatmul.bf16.vlgmr.msrb.gmra.mxu1 %v166_v36  ;;  %v2061_v36 = vor.u32 %v2788_v27, %v2058_v35  ;;  %v2844_v27 = vld [vmem:[#allocation7 + $0x2d4] sm:$0xf]  ;;  %v2282_v35 = vld [vmem:[#allocation7 + $0x2d8] sm:$0xf0] }
  0xb1   :  { %893 = vmatpush.bf16.msra.mxu3 %v2297_v46  ;;  %921 = vmatpush.bf16.msrb.mxu1 %v2301_v50  ;;  %v2285_v38 = vor.u32 %v2844_v27, %v2282_v35  ;;  %v2273_v46 = vor.u32 %v2843_v44, %v2272_v43  ;;  %v2829_v50 = vld [vmem:[#allocation7 + $0x254] sm:$0xf0]  ;;  %v2822_v27 = vld [vmem:[#allocation7 + $0x224] sm:$0xf]  ;;  %v2194_v35 = vld [vmem:[#allocation7 + $0x228] sm:$0xf0] }
  0xb2   :  { %652 = vmatpush.bf16.msra.mxu0 %v2061_v36  ;;  %625 = vmatpush.bf16.msrb.mxu2 %v2049_v40  ;;  %v2224_v36 = vld [vmem:[#allocation7 + $0x260] sm:$0xf]  ;;  %v2830_v40 = vld [vmem:[#allocation7 + $0x264] sm:$0xf]  ;;  %v2217_v51 = vor.u32 %v2829_v50, %v2216_v49  ;;  %v2184_v43 = vld [vmem:[#allocation7 + $0x210] sm:$0xf] }
  0xb3   :  { %v2225_v39 = vor.u32 %v2831_v37, %v2224_v36  ;;  %v2197_v36 = vor.u32 %v2822_v27, %v2194_v35  ;;  %v2240_v37 = vld [vmem:[#allocation7 + $0x280] sm:$0xf]  ;;  %v2821_v44 = vld [vmem:[#allocation7 + $0x214] sm:$0xf0]  ;;  %v2819_v50 = vld [vmem:[#allocation7 + $0x204] sm:$0xf0] }
  0xb4   :  { %v2176_v49 = vld [vmem:[#allocation7 + $0x200] sm:$0xf] }
  0xb5   :  { %894 = vmatpush.bf16.msra.mxu3 %v2289_v53  ;;  %922 = vmatpush.bf16.msrb.mxu1 %v2293_v54  ;;  %v2218_v53 = vld [vmem:[#allocation7 + $0x258] sm:$0xf0] }
  0xb6   :  { %653 = vmatpush.bf16.msra.mxu0 %v2053_v42  ;;  %879 = vmatpush.bf16.msra.mxu2 %v2233_v18  ;;  %v2229_v42 = vor.u32 %v2830_v40, %v2226_v41  ;;  %v2221_v54 = vor.u32 %v2828_v52, %v2218_v53  ;;  %v2249_v18 = vor.u32 %v2837_v16, %v2248_v15  ;;  %v2242_v41 = vld [vmem:[#allocation7 + $0x288] sm:$0xf0] }
  0xb7   :  { %v2177_v52 = vor.u32 %v2819_v50, %v2176_v49  ;;  %v2178_v53 = vld [vmem:[#allocation7 + $0x208] sm:$0xf0]  ;;  %v2352_v49 = vld [vmem:[#allocation7 + $0x360] sm:$0xf]  ;;  %v2863_v50 = vld [vmem:[#allocation7 + $0x364] sm:$0xf0] }
  0xb9   :  { %895 = vmatpush.bf16.msra.mxu3 %v2281_v29  ;;  %923 = vmatpush.bf16.msrb.mxu1 %v2285_v38  ;;  %v2193_v29 = vor.u32 %v2823_v24, %v2192_v23  ;;  %v2835_v38 = vld [vmem:[#allocation7 + $0x284] sm:$0xf0] }
  0xba   :  { %907 = vmatpush.bf16.msrb.mxu0 %v2237_v22  ;;  %880 = vmatpush.bf16.msra.mxu2 %v2225_v39  ;;  %v2253_v22 = vor.u32 %v2836_v17, %v2250_v20  ;;  %v2834_v39 = vld [vmem:[#allocation7 + $0x284] sm:$0xf]  ;;  %v2241_v40 = vor.u32 %v2835_v38, %v2240_v37 }
  0xbd   :  { %896 = vmatpush.bf16.msra.mxu3 %v2273_v46  ;;  %924 = vmatpush.bf16.msrb.mxu1 %v2277_v48  ;;  %v2185_v46 = vor.u32 %v2821_v44, %v2184_v43  ;;  %v2189_v48 = vor.u32 %v2820_v45, %v2186_v47  ;;  %v2876_v45 = vld [vmem:[#allocation7 + $0x3d4] sm:$0xf]  ;;  %v2410_v47 = vld [vmem:[#allocation7 + $0x3d8] sm:$0xf0] }
  0xbe   :  { %908 = vmatpush.bf16.msrb.mxu0 %v2229_v42  ;;  %881 = vmatpush.bf16.msra.mxu2 %v2217_v51  ;;  %v2245_v42 = vor.u32 %v2834_v39, %v2242_v41  ;;  %v2818_v51 = vld [vmem:[#allocation7 + $0x204] sm:$0xf] }
  0xc2   :  { %909 = vmatpush.bf16.msrb.mxu0 %v2221_v54  ;;  %v2181_v54 = vor.u32 %v2818_v51, %v2178_v53  ;;  %v2354_v51 = vld [vmem:[#allocation7 + $0x368] sm:$0xf0] }
 0x12a   :  { %v398_v55 = vpop.f32.mrf.mxu0 }
 0x12b   :  { %v399_v58 = vadd.f32 %v398_v55, %v200_v56  ;;  %v2264_v55 = vld [vmem:[#allocation7 + $0x2b0] sm:$0xf] }
 0x12d   :  { %v412_v57 = vpop.f32.mrf.mxu1 }
 0x12e   :  { %v413_v63 = vadd.f32 %v412_v57, %v399_v58  ;;  %v2840_v57 = vld [vmem:[#allocation7 + $0x2b4] sm:$0xf] }
 0x130   :  { %v370_v59 = vpop.f32.mrf.mxu2  ;;  %v418_v4 = vmax.f32 %v413_v63, 0.0  ;;  %v2826_v63 = vld [vmem:[#allocation7 + $0x244] sm:$0xf] }
 0x131   :  { %v371_v2 = vadd.f32 %v370_v59, %v199_v60  ;;  %v2266_v59 = vld [vmem:[#allocation7 + $0x2b8] sm:$0xf0] }
 0x132   :  { %v400_v62 = vpop.f32.mrf.mxu0 }
 0x133   :  { %v384_v61 = vpop.f32.mrf.mxu3  ;;  %v401_v0 = vadd.f32 %v400_v62, %v200_v56  ;;  %v2841_v56 = vld [vmem:[#allocation7 + $0x2b4] sm:$0xf0]  ;;  %v2827_v62 = vld [vmem:[#allocation7 + $0x244] sm:$0xf0] }
 0x134   :  { %v385_v7 = vadd.f32 %v384_v61, %v371_v2  ;;  %v2265_v58 = vor.u32 %v2841_v56, %v2264_v55  ;;  %v2208_v61 = vld [vmem:[#allocation7 + $0x240] sm:$0xf]  ;;  %v2424_v55 = vld [vmem:[#allocation7 + $0x3f0] sm:$0xf]  ;;  %v2881_v56 = vld [vmem:[#allocation7 + $0x3f4] sm:$0xf0] }
 0x135   :  { %v414_v1 = vpop.f32.mrf.mxu1 }
 0x136   :  { %v415_v3 = vadd.f32 %v414_v1, %v401_v0  ;;  %v417_v12 = vmax.f32 %v385_v7, 0.0  ;;  %897 = vmatpush.bf16.msra.mxu3 %v2265_v58  ;;  %v2209_v0 = vor.u32 %v2827_v62, %v2208_v61  ;;  %v2210_v1 = vld [vmem:[#allocation7 + $0x248] sm:$0xf0]  ;;  %v2425_v58 = vor.u32 %v2881_v56, %v2424_v55  ;;  %v2879_v61 = vld [vmem:[#allocation7 + $0x3e4] sm:$0xf0] }
 0x137   :  { %v2213_v2 = vor.u32 %v2826_v63, %v2210_v1  ;;  %v2258_v7 = vld [vmem:[#allocation7 + $0x2a8] sm:$0xf0]  ;;  %v2878_v63 = vld [vmem:[#allocation7 + $0x3e4] sm:$0xf]  ;;  %v2360_v1 = vld [vmem:[#allocation7 + $0x370] sm:$0xf] }
 0x138   :  { %v420_v5 = vmax.f32 %v415_v3, 0.0  ;;  %v372_v6 = vpop.f32.mrf.mxu2  ;;  %v2256_v3 = vld [vmem:[#allocation7 + $0x2a0] sm:$0xf]  ;;  %882 = vmatpush.bf16.msra.mxu2 %v2209_v0  ;;  %v2418_v0 = vld [vmem:[#allocation7 + $0x3e8] sm:$0xf0] }
 0x139   :  { %v373_v9 = vadd.f32 %v372_v6, %v199_v60  ;;  %v2269_v60 = vor.u32 %v2840_v57, %v2266_v59  ;;  %v2838_v6 = vld [vmem:[#allocation7 + $0x2a4] sm:$0xf]  ;;  %910 = vmatpush.bf16.msrb.mxu0 %v2213_v2  ;;  %v2880_v57 = vld [vmem:[#allocation7 + $0x3f4] sm:$0xf]  ;;  %v2426_v59 = vld [vmem:[#allocation7 + $0x3f8] sm:$0xf0] }
 0x13a   :  { %v422_v8 = vpack.c.bf16 %v420_v5, %v418_v4  ;;  %v2839_v4 = vld [vmem:[#allocation7 + $0x2a4] sm:$0xf0]  ;;  %v2429_v62 = vor.u32 %v2880_v57, %v2426_v59  ;;  %v2402_v55 = vld [vmem:[#allocation7 + $0x3c8] sm:$0xf0]  ;;  %v2344_v57 = vld [vmem:[#allocation7 + $0x350] sm:$0xf] }
 0x13b   :  { %v386_v10 = vpop.f32.mrf.mxu3  ;;  %925 = vmatpush.bf16.msrb.mxu1 %v2269_v60  ;;  %v2257_v5 = vor.u32 %v2839_v4, %v2256_v3  ;;  %v2416_v60 = vld [vmem:[#allocation7 + $0x3e0] sm:$0xf]  ;;  %v2865_v3 = vld [vmem:[#allocation7 + $0x374] sm:$0xf0]  ;;  %v2864_v4 = vld [vmem:[#allocation7 + $0x374] sm:$0xf] }
 0x13c   :  { %v387_v11 = vadd.f32 %v386_v10, %v373_v9  ;;  %640 = vmatmul.bf16.vlgmr.msrb.gmra.mxu3 %v422_v8  ;;  %668 = vmatmul.bf16.vlgmr.msra.gmra.mxu1 %v422_v8  ;;  %v2261_v8 = vor.u32 %v2838_v6, %v2258_v7  ;;  %v2200_v9 = vld [vmem:[#allocation7 + $0x230] sm:$0xf]  ;;  %v2825_v10 = vld [vmem:[#allocation7 + $0x234] sm:$0xf0]  ;;  %v2417_v2 = vor.u32 %v2879_v61, %v2416_v60  ;;  %v2860_v59 = vld [vmem:[#allocation7 + $0x354] sm:$0xf] }
 0x13d   :  { %898 = vmatpush.bf16.msra.mxu3 %v2257_v5  ;;  %v2362_v5 = vld [vmem:[#allocation7 + $0x378] sm:$0xf0]  ;;  %v2421_v6 = vor.u32 %v2878_v63, %v2418_v0  ;;  %v2361_v7 = vor.u32 %v2865_v3, %v2360_v1  ;;  %v2392_v63 = vld [vmem:[#allocation7 + $0x3b0] sm:$0xf]  ;;  %v2873_v0 = vld [vmem:[#allocation7 + $0x3b4] sm:$0xf0] }
 0x13e   :  { %v419_v13 = vmax.f32 %v387_v11, 0.0  ;;  %v2824_v11 = vld [vmem:[#allocation7 + $0x234] sm:$0xf]  ;;  %v2346_v61 = vld [vmem:[#allocation7 + $0x358] sm:$0xf0]  ;;  %v2393_v1 = vor.u32 %v2873_v0, %v2392_v63 }
 0x13f   :  { %926 = vmatpush.bf16.msrb.mxu1 %v2261_v8  ;;  %v2365_v8 = vor.u32 %v2864_v4, %v2362_v5  ;;  %v2394_v3 = vld [vmem:[#allocation7 + $0x3b8] sm:$0xf0]  ;;  %v2336_v5 = vld [vmem:[#allocation7 + $0x340] sm:$0xf] }
 0x140   :  { %v421_v14 = vpack.c.bf16 %v419_v13, %v417_v12  ;;  %v2201_v12 = vor.u32 %v2825_v10, %v2200_v9  ;;  %v2202_v13 = vld [vmem:[#allocation7 + $0x238] sm:$0xf0]  ;;  %v457_v9 = vperm.slane %v3194_v21, 4  ;;  %v2544_v0 = vld [vmem:[#allocation7 + $0x4e0] sm:$0xf] }
 0x141   :  { %899 = vmatpush.bf16.msra.mxu3 %v2249_v18  ;;  %v2554_v63 = vld [vmem:[#allocation7 + $0x4f8] sm:$0xf0] }
 0x142   :  { %626 = vmatmul.bf16.vlgmr.msrb.gmra.mxu2 %v421_v14  ;;  %654 = vmatmul.bf16.vlgmr.msra.gmra.mxu0 %v421_v14  ;;  %v2205_v14 = vor.u32 %v2824_v11, %v2202_v13  ;;  %v456_v13 = vperm.slane %v3192_v19, 4 }
 0x143   :  { %883 = vmatpush.bf16.msra.mxu2 %v2201_v12  ;;  %927 = vmatpush.bf16.msrb.mxu1 %v2253_v22 }
 0x144   :  { %911 = vmatpush.bf16.msrb.mxu0 %v2205_v14 }
 0x145   :  { %900 = vmatpush.bf16.msra.mxu3 %v2241_v40 }
 0x147   :  { %884 = vmatpush.bf16.msra.mxu2 %v2193_v29  ;;  %928 = vmatpush.bf16.msrb.mxu1 %v2245_v42 }
 0x148   :  { %912 = vmatpush.bf16.msrb.mxu0 %v2197_v36 }
 0x149   :  { %1150 = vmatpush.bf16.msrb.mxu3 %v2425_v58  ;;  %v2861_v58 = vld [vmem:[#allocation7 + $0x354] sm:$0xf0] }
 0x14a   :  { %v2345_v60 = vor.u32 %v2861_v58, %v2344_v57  ;;  %v2306_v57 = vld [vmem:[#allocation7 + $0x308] sm:$0xf0] }
 0x14b   :  { %885 = vmatpush.bf16.msra.mxu2 %v2185_v46  ;;  %1178 = vmatpush.bf16.msra.mxu1 %v2429_v62  ;;  %v2349_v62 = vor.u32 %v2860_v59, %v2346_v61  ;;  %v2552_v59 = vld [vmem:[#allocation7 + $0x4f0] sm:$0xf]  ;;  %v2912_v61 = vld [vmem:[#allocation7 + $0x4f4] sm:$0xf] }
 0x14c   :  { %913 = vmatpush.bf16.msrb.mxu0 %v2189_v48  ;;  %v2413_v48 = vor.u32 %v2876_v45, %v2410_v47  ;;  %v2368_v45 = vld [vmem:[#allocation7 + $0x380] sm:$0xf]  ;;  %v2866_v47 = vld [vmem:[#allocation7 + $0x384] sm:$0xf] }
 0x14d   :  { %1151 = vmatpush.bf16.msrb.mxu3 %v2417_v2  ;;  %v2872_v2 = vld [vmem:[#allocation7 + $0x3b4] sm:$0xf] }
 0x14e   :  { %v2397_v4 = vor.u32 %v2872_v2, %v2394_v3  ;;  %v2557_v2 = vor.u32 %v2912_v61, %v2554_v63  ;;  %v2910_v3 = vld [vmem:[#allocation7 + $0x4e4] sm:$0xf]  ;;  %v2474_v63 = vld [vmem:[#allocation7 + $0x458] sm:$0xf0] }
 0x14f   :  { %886 = vmatpush.bf16.msra.mxu2 %v2177_v52  ;;  %1179 = vmatpush.bf16.msra.mxu1 %v2421_v6  ;;  %v2357_v52 = vor.u32 %v2862_v25, %v2354_v51  ;;  %v2859_v6 = vld [vmem:[#allocation7 + $0x344] sm:$0xf0]  ;;  %v2312_v25 = vld [vmem:[#allocation7 + $0x310] sm:$0xf]  ;;  %v2852_v51 = vld [vmem:[#allocation7 + $0x314] sm:$0xf] }
 0x150   :  { %914 = vmatpush.bf16.msrb.mxu0 %v2181_v54  ;;  %v2874_v54 = vld [vmem:[#allocation7 + $0x3c4] sm:$0xf] }
 0x151   :  { %v2405_v56 = vor.u32 %v2874_v54, %v2402_v55  ;;  %v2851_v54 = vld [vmem:[#allocation7 + $0x304] sm:$0xf0]  ;;  %v2850_v55 = vld [vmem:[#allocation7 + $0x304] sm:$0xf] }
 0x152   :  { %v2309_v58 = vor.u32 %v2850_v55, %v2306_v57  ;;  %v2906_v55 = vld [vmem:[#allocation7 + $0x4c4] sm:$0xf]  ;;  %v2530_v57 = vld [vmem:[#allocation7 + $0x4c8] sm:$0xf0] }
 0x153   :  { %1136 = vmatpush.bf16.msrb.mxu2 %v2361_v7  ;;  %1180 = vmatpush.bf16.msra.mxu1 %v2413_v48  ;;  %v2858_v7 = vld [vmem:[#allocation7 + $0x344] sm:$0xf] }
 0x154   :  { %1164 = vmatpush.bf16.msra.mxu0 %v2365_v8  ;;  %v2337_v8 = vor.u32 %v2859_v6, %v2336_v5 }
 0x157   :  { %1181 = vmatpush.bf16.msra.mxu1 %v2405_v56 }
 0x158   :  { %1165 = vmatpush.bf16.msra.mxu0 %v2357_v52 }
 0x15b   :  { %1182 = vmatpush.bf16.msra.mxu1 %v2397_v4  ;;  %v2546_v4 = vld [vmem:[#allocation7 + $0x4e8] sm:$0xf0] }
 0x15c   :  { %1166 = vmatpush.bf16.msra.mxu0 %v2349_v62  ;;  %v2549_v6 = vor.u32 %v2910_v3, %v2546_v4  ;;  %v2904_v3 = vld [vmem:[#allocation7 + $0x4b4] sm:$0xf] }
 0x1b9   :  { %v669_v10 = vpop.f32.mrf.mxu1 }
 0x1bf   :  { %v655_v11 = vpop.f32.mrf.mxu0  ;;  %v641_v14 = vpop.f32.mrf.mxu3 }
 0x1c0   :  { %v656_v12 = vadd.f32 %v655_v11, %v457_v9  ;;  %v2384_v11 = vld [vmem:[#allocation7 + $0x3a0] sm:$0xf] }
 0x1c1   :  { %v671_v22 = vpop.f32.mrf.mxu1 }
 0x1c2   :  { %v670_v16 = vadd.f32 %v669_v10, %v656_v12  ;;  %v2871_v12 = vld [vmem:[#allocation7 + $0x3a4] sm:$0xf0] }
 0x1c4   :  { %v675_v23 = vmax.f32 %v670_v16, 0.0 }
 0x1c5   :  { %v627_v15 = vpop.f32.mrf.mxu2 }
 0x1c6   :  { %v628_v18 = vadd.f32 %v627_v15, %v456_v13  ;;  %v3224_v36 = vadd.f32 %v675_v23, %v162_v33  ;;  %v2408_v33 = vld [vmem:[#allocation7 + $0x3d0] sm:$0xf]  ;;  %v2386_v15 = vld [vmem:[#allocation7 + $0x3a8] sm:$0xf0]  ;;  %v2330_v23 = vld [vmem:[#allocation7 + $0x338] sm:$0xf0] }
 0x1c7   :  { %v657_v17 = vpop.f32.mrf.mxu0  ;;  %v643_v39 = vpop.f32.mrf.mxu3 }
 0x1c8   :  { %v658_v20 = vadd.f32 %v657_v17, %v457_v9  ;;  %v642_v27 = vadd.f32 %v641_v14, %v628_v18  ;;  %v2338_v9 = vld [vmem:[#allocation7 + $0x348] sm:$0xf0]  ;;  %v2385_v14 = vor.u32 %v2871_v12, %v2384_v11  ;;  %v2328_v17 = vld [vmem:[#allocation7 + $0x330] sm:$0xf]  ;;  %v2857_v18 = vld [vmem:[#allocation7 + $0x334] sm:$0xf0] }
 0x1c9   :  { %v2341_v10 = vor.u32 %v2858_v7, %v2338_v9  ;;  %v718_v9 = vperm.slane %v3194_v21, 2 }
 0x1ca   :  { %v672_v24 = vadd.f32 %v671_v22, %v658_v20  ;;  %v674_v40 = vmax.f32 %v642_v27, 0.0  ;;  %v2856_v20 = vld [vmem:[#allocation7 + $0x334] sm:$0xf]  ;;  %v2329_v22 = vor.u32 %v2857_v18, %v2328_v17  ;;  %v2376_v27 = vld [vmem:[#allocation7 + $0x390] sm:$0xf] }
 0x1cb   :  { %1167 = vmatpush.bf16.msra.mxu0 %v2341_v10 }
 0x1cc   :  { %v677_v29 = vmax.f32 %v672_v24, 0.0  ;;  %v3234_v44 = vadd.f32 %v674_v40, %v161_v31  ;;  %v2353_v31 = vor.u32 %v2863_v50, %v2352_v49  ;;  %v2333_v24 = vor.u32 %v2856_v20, %v2330_v23  ;;  %v2370_v49 = vld [vmem:[#allocation7 + $0x388] sm:$0xf0] }
 0x1cd   :  { %v629_v35 = vpop.f32.mrf.mxu2  ;;  %v2373_v50 = vor.u32 %v2866_v47, %v2370_v49  ;;  %v2908_v47 = vld [vmem:[#allocation7 + $0x4d4] sm:$0xf]  ;;  %v2538_v49 = vld [vmem:[#allocation7 + $0x4d8] sm:$0xf0] }
 0x1ce   :  { %v3228_v37 = vadd.f32 %v677_v29, %v164_v34  ;;  %v630_v38 = vadd.f32 %v629_v35, %v456_v13  ;;  %v2877_v34 = vld [vmem:[#allocation7 + $0x3d4] sm:$0xf0]  ;;  %1137 = vmatpush.bf16.msrb.mxu2 %v2353_v31  ;;  %v2870_v13 = vld [vmem:[#allocation7 + $0x3a4] sm:$0xf]  ;;  %v2868_v35 = vld [vmem:[#allocation7 + $0x394] sm:$0xf] }
 0x1cf   :  { %v2409_v46 = vor.u32 %v2877_v34, %v2408_v33  ;;  %v2389_v16 = vor.u32 %v2870_v13, %v2386_v15  ;;  %v2869_v29 = vld [vmem:[#allocation7 + $0x394] sm:$0xf0]  ;;  %1168 = vmatpush.bf16.msra.mxu0 %v2333_v24  ;;  %v2322_v33 = vld [vmem:[#allocation7 + $0x328] sm:$0xf0]  ;;  %v717_v13 = vperm.slane %v3192_v19, 2 }
 0x1d0   :  { %v683_v41 = vpack.c.bf16 %v3228_v37, %v3224_v36  ;;  %v644_v42 = vadd.f32 %v643_v39, %v630_v38  ;;  %v2377_v38 = vor.u32 %v2869_v29, %v2376_v27  ;;  %v2378_v39 = vld [vmem:[#allocation7 + $0x398] sm:$0xf0]  ;;  %v2853_v31 = vld [vmem:[#allocation7 + $0x314] sm:$0xf0]  ;;  %v2488_v19 = vld [vmem:[#allocation7 + $0x470] sm:$0xf] }
 0x1d1   :  { %1152 = vmatpush.bf16.msrb.mxu3 %v2409_v46  ;;  %1183 = vmatpush.bf16.msra.mxu1 %v2389_v16  ;;  %v2381_v40 = vor.u32 %v2868_v35, %v2378_v39  ;;  %v2867_v46 = vld [vmem:[#allocation7 + $0x384] sm:$0xf0] }
 0x1d2   :  { %v676_v43 = vmax.f32 %v644_v42, 0.0  ;;  %901 = vmatmul.bf16.vlgmr.msra.gmra.mxu3 %v683_v41  ;;  %929 = vmatmul.bf16.vlgmr.msrb.gmra.mxu1 %v683_v41  ;;  %v2320_v41 = vld [vmem:[#allocation7 + $0x320] sm:$0xf]  ;;  %v2855_v42 = vld [vmem:[#allocation7 + $0x324] sm:$0xf0]  ;;  %v2369_v48 = vor.u32 %v2867_v46, %v2368_v45 }
 0x1d3   :  { %1138 = vmatpush.bf16.msrb.mxu2 %v2345_v60  ;;  %v2913_v60 = vld [vmem:[#allocation7 + $0x4f4] sm:$0xf0]  ;;  %v2536_v45 = vld [vmem:[#allocation7 + $0x4d0] sm:$0xf] }
 0x1d4   :  { %v3238_v26 = vadd.f32 %v676_v43, %v163_v32  ;;  %v2875_v32 = vld [vmem:[#allocation7 + $0x3c4] sm:$0xf0]  ;;  %v2854_v43 = vld [vmem:[#allocation7 + $0x324] sm:$0xf]  ;;  %v2553_v62 = vor.u32 %v2913_v60, %v2552_v59  ;;  %v2909_v46 = vld [vmem:[#allocation7 + $0x4d4] sm:$0xf0] }
 0x1d5   :  { %v2401_v53 = vor.u32 %v2875_v32, %v2400_v28  ;;  %1184 = vmatpush.bf16.msra.mxu1 %v2381_v40  ;;  %v2325_v34 = vor.u32 %v2854_v43, %v2322_v33  ;;  %v2313_v28 = vor.u32 %v2853_v31, %v2312_v25  ;;  %v2314_v32 = vld [vmem:[#allocation7 + $0x318] sm:$0xf0]  ;;  %v2896_v43 = vld [vmem:[#allocation7 + $0x474] sm:$0xf]  ;;  %v2895_v25 = vld [vmem:[#allocation7 + $0x464] sm:$0xf0]  ;;  %v2541_v31 = vor.u32 %v2908_v47, %v2538_v49 }
 0x1d6   :  { %v682_v30 = vpack.c.bf16 %v3238_v26, %v3234_v44  ;;  %v2317_v52 = vor.u32 %v2852_v51, %v2314_v32  ;;  %v2490_v33 = vld [vmem:[#allocation7 + $0x478] sm:$0xf0]  ;;  %v2482_v32 = vld [vmem:[#allocation7 + $0x468] sm:$0xf0]  ;;  %v2472_v59 = vld [vmem:[#allocation7 + $0x450] sm:$0xf] }
 0x1d7   :  { %1153 = vmatpush.bf16.msrb.mxu3 %v2401_v53  ;;  %1139 = vmatpush.bf16.msrb.mxu2 %v2337_v8  ;;  %v2304_v53 = vld [vmem:[#allocation7 + $0x300] sm:$0xf]  ;;  %v2893_v60 = vld [vmem:[#allocation7 + $0x454] sm:$0xf0]  ;;  %v2898_v47 = vld [vmem:[#allocation7 + $0x484] sm:$0xf] }
 0x1d8   :  { %887 = vmatmul.bf16.vlgmr.msra.gmra.mxu2 %v682_v30  ;;  %915 = vmatmul.bf16.vlgmr.msrb.gmra.mxu0 %v682_v30  ;;  %v2321_v30 = vor.u32 %v2855_v42, %v2320_v41  ;;  %v2305_v56 = vor.u32 %v2851_v54, %v2304_v53  ;;  %v2897_v42 = vld [vmem:[#allocation7 + $0x474] sm:$0xf0]  ;;  %v2528_v53 = vld [vmem:[#allocation7 + $0x4c0] sm:$0xf]  ;;  %v2907_v54 = vld [vmem:[#allocation7 + $0x4c4] sm:$0xf0]  ;;  %v2473_v61 = vor.u32 %v2893_v60, %v2472_v59 }
 0x1d9   :  { %1169 = vmatpush.bf16.msra.mxu0 %v2325_v34  ;;  %1185 = vmatpush.bf16.msra.mxu1 %v2373_v50  ;;  %v2493_v34 = vor.u32 %v2896_v43, %v2490_v33  ;;  %v2480_v50 = vld [vmem:[#allocation7 + $0x460] sm:$0xf]  ;;  %v2886_v43 = vld [vmem:[#allocation7 + $0x424] sm:$0xf]  ;;  %v2450_v33 = vld [vmem:[#allocation7 + $0x428] sm:$0xf0] }
 0x1da   :  { %v2481_v51 = vor.u32 %v2895_v25, %v2480_v50  ;;  %v2498_v49 = vld [vmem:[#allocation7 + $0x488] sm:$0xf0]  ;;  %v2440_v25 = vld [vmem:[#allocation7 + $0x410] sm:$0xf]  ;;  %v2945_v60 = vld [vmem:[#allocation7 + $0x5f4] sm:$0xf0] }
 0x1db   :  { %1154 = vmatpush.bf16.msrb.mxu3 %v2393_v1  ;;  %1140 = vmatpush.bf16.msrb.mxu2 %v2329_v22  ;;  %v2911_v1 = vld [vmem:[#allocation7 + $0x4e4] sm:$0xf0]  ;;  %v2501_v50 = vor.u32 %v2898_v47, %v2498_v49  ;;  %v2680_v59 = vld [vmem:[#allocation7 + $0x5f0] sm:$0xf] }
 0x1dc   :  { %v2545_v5 = vor.u32 %v2911_v1, %v2544_v0  ;;  %v2520_v1 = vld [vmem:[#allocation7 + $0x4b0] sm:$0xf] }
 0x1dd   :  { %1170 = vmatpush.bf16.msra.mxu0 %v2317_v52  ;;  %1439 = vmatpush.bf16.msrb.mxu1 %v2557_v2  ;;  %v2905_v2 = vld [vmem:[#allocation7 + $0x4b4] sm:$0xf0] }
 0x1de   :  { %v2521_v4 = vor.u32 %v2905_v2, %v2520_v1  ;;  %v2943_v1 = vld [vmem:[#allocation7 + $0x5e4] sm:$0xf0] }
 0x1df   :  { %1155 = vmatpush.bf16.msrb.mxu3 %v2385_v14  ;;  %1141 = vmatpush.bf16.msrb.mxu2 %v2321_v30  ;;  %v2489_v30 = vor.u32 %v2897_v42, %v2488_v19  ;;  %v2448_v19 = vld [vmem:[#allocation7 + $0x420] sm:$0xf]  ;;  %v2887_v42 = vld [vmem:[#allocation7 + $0x424] sm:$0xf0] }
 0x1e1   :  { %1171 = vmatpush.bf16.msra.mxu0 %v2309_v58  ;;  %1440 = vmatpush.bf16.msrb.mxu1 %v2549_v6  ;;  %v2533_v58 = vor.u32 %v2906_v55, %v2530_v57  ;;  %v2882_v55 = vld [vmem:[#allocation7 + $0x404] sm:$0xf]  ;;  %v2434_v57 = vld [vmem:[#allocation7 + $0x408] sm:$0xf0] }
 0x1e3   :  { %1156 = vmatpush.bf16.msrb.mxu3 %v2377_v38  ;;  %1142 = vmatpush.bf16.msrb.mxu2 %v2313_v28  ;;  %v2894_v28 = vld [vmem:[#allocation7 + $0x464] sm:$0xf] }
 0x1e4   :  { %v2485_v52 = vor.u32 %v2894_v28, %v2482_v32  ;;  %v2442_v32 = vld [vmem:[#allocation7 + $0x418] sm:$0xf0] }
 0x1e5   :  { %1425 = vmatpush.bf16.msrb.mxu0 %v2493_v34  ;;  %1441 = vmatpush.bf16.msrb.mxu1 %v2541_v31  ;;  %v2453_v34 = vor.u32 %v2886_v43, %v2450_v33  ;;  %v2885_v31 = vld [vmem:[#allocation7 + $0x414] sm:$0xf0] }
 0x1e6   :  { %v2441_v28 = vor.u32 %v2885_v31, %v2440_v25  ;;  %v2940_v25 = vld [vmem:[#allocation7 + $0x5d4] sm:$0xf] }
 0x1e7   :  { %1157 = vmatpush.bf16.msrb.mxu3 %v2369_v48  ;;  %1143 = vmatpush.bf16.msrb.mxu2 %v2305_v56  ;;  %v2537_v48 = vor.u32 %v2909_v46, %v2536_v45  ;;  %v2529_v56 = vor.u32 %v2907_v54, %v2528_v53  ;;  %v2496_v45 = vld [vmem:[#allocation7 + $0x480] sm:$0xf]  ;;  %v2899_v46 = vld [vmem:[#allocation7 + $0x484] sm:$0xf0] }
 0x1e8   :  { %v2432_v53 = vld [vmem:[#allocation7 + $0x400] sm:$0xf]  ;;  %v2883_v54 = vld [vmem:[#allocation7 + $0x404] sm:$0xf0] }
 0x1e9   :  { %1426 = vmatpush.bf16.msrb.mxu0 %v2485_v52  ;;  %1442 = vmatpush.bf16.msrb.mxu1 %v2533_v58  ;;  %v2437_v58 = vor.u32 %v2882_v55, %v2434_v57  ;;  %v2656_v55 = vld [vmem:[#allocation7 + $0x5c0] sm:$0xf] }
 0x1eb   :  { %1411 = vmatpush.bf16.msra.mxu3 %v2553_v62  ;;  %1397 = vmatpush.bf16.msra.mxu2 %v2489_v30  ;;  %v2892_v62 = vld [vmem:[#allocation7 + $0x454] sm:$0xf]  ;;  %v2449_v30 = vor.u32 %v2887_v42, %v2448_v19 }
 0x1ec   :  { %v2477_v0 = vor.u32 %v2892_v62, %v2474_v63  ;;  %v2681_v62 = vor.u32 %v2945_v60, %v2680_v59  ;;  %v2682_v63 = vld [vmem:[#allocation7 + $0x5f8] sm:$0xf0]  ;;  %v2658_v59 = vld [vmem:[#allocation7 + $0x5c8] sm:$0xf0] }
 0x1ee   :  { %1427 = vmatpush.bf16.msrb.mxu0 %v2477_v0  ;;  %v2672_v0 = vld [vmem:[#allocation7 + $0x5e0] sm:$0xf] }
 0x1ef   :  { %1412 = vmatpush.bf16.msra.mxu3 %v2545_v5  ;;  %1398 = vmatpush.bf16.msra.mxu2 %v2481_v51  ;;  %v2522_v5 = vld [vmem:[#allocation7 + $0x4b8] sm:$0xf0]  ;;  %v2884_v51 = vld [vmem:[#allocation7 + $0x414] sm:$0xf] }
 0x1f0   :  { %v2525_v6 = vor.u32 %v2904_v3, %v2522_v5  ;;  %v2445_v52 = vor.u32 %v2884_v51, %v2442_v32  ;;  %v2942_v3 = vld [vmem:[#allocation7 + $0x5e4] sm:$0xf]  ;;  %v2616_v5 = vld [vmem:[#allocation7 + $0x570] sm:$0xf]  ;;  %v2666_v51 = vld [vmem:[#allocation7 + $0x5d8] sm:$0xf0] }
 0x1f1   :  { %v2608_v32 = vld [vmem:[#allocation7 + $0x560] sm:$0xf] }
 0x1f2   :  { %1443 = vmatpush.bf16.msrb.mxu1 %v2525_v6  ;;  %v2673_v6 = vor.u32 %v2943_v1, %v2672_v0  ;;  %v2602_v1 = vld [vmem:[#allocation7 + $0x558] sm:$0xf0] }
 0x1f3   :  { %1413 = vmatpush.bf16.msra.mxu3 %v2537_v48  ;;  %1399 = vmatpush.bf16.msra.mxu2 %v2473_v61  ;;  %v2497_v48 = vor.u32 %v2899_v46, %v2496_v45  ;;  %v2944_v61 = vld [vmem:[#allocation7 + $0x5f4] sm:$0xf] }
 0x1f4   :  { %v2685_v2 = vor.u32 %v2944_v61, %v2682_v63  ;;  %v2600_v61 = vld [vmem:[#allocation7 + $0x550] sm:$0xf]  ;;  %v2924_v63 = vld [vmem:[#allocation7 + $0x554] sm:$0xf] }
 0x1f7   :  { %1414 = vmatpush.bf16.msra.mxu3 %v2529_v56  ;;  %v2433_v56 = vor.u32 %v2883_v54, %v2432_v53  ;;  %v2926_v53 = vld [vmem:[#allocation7 + $0x564] sm:$0xf]  ;;  %v2610_v54 = vld [vmem:[#allocation7 + $0x568] sm:$0xf0] }
 0x1fb   :  { %1415 = vmatpush.bf16.msra.mxu3 %v2521_v4  ;;  %v2674_v4 = vld [vmem:[#allocation7 + $0x5e8] sm:$0xf0] }
 0x24f   :  { %v930_v7 = vpop.f32.mrf.mxu1 }
 0x255   :  { %v916_v8 = vpop.f32.mrf.mxu0  ;;  %v902_v11 = vpop.f32.mrf.mxu3 }
 0x256   :  { %v917_v10 = vadd.f32 %v916_v8, %v718_v9  ;;  %v2891_v8 = vld [vmem:[#allocation7 + $0x444] sm:$0xf0] }
 0x257   :  { %v932_v17 = vpop.f32.mrf.mxu1 }
 0x258   :  { %v931_v15 = vadd.f32 %v930_v7, %v917_v10  ;;  %v2464_v7 = vld [vmem:[#allocation7 + $0x440] sm:$0xf] }
 0x259   :  { %v2465_v10 = vor.u32 %v2891_v8, %v2464_v7  ;;  %v2929_v7 = vld [vmem:[#allocation7 + $0x574] sm:$0xf0]  ;;  %v2928_v8 = vld [vmem:[#allocation7 + $0x574] sm:$0xf] }
 0x25a   :  { %v936_v22 = vmax.f32 %v931_v15, 0.0 }
 0x25b   :  { %v888_v12 = vpop.f32.mrf.mxu2  ;;  %1400 = vmatpush.bf16.msra.mxu2 %v2465_v10  ;;  %v2677_v10 = vor.u32 %v2942_v3, %v2674_v4  ;;  %v2648_v3 = vld [vmem:[#allocation7 + $0x5b0] sm:$0xf]  ;;  %v2937_v4 = vld [vmem:[#allocation7 + $0x5b4] sm:$0xf0] }
 0x25c   :  { %v889_v18 = vadd.f32 %v888_v12, %v717_v13 }
 0x25d   :  { %v918_v14 = vpop.f32.mrf.mxu0  ;;  %v904_v38 = vpop.f32.mrf.mxu3 }
 0x25e   :  { %v919_v16 = vadd.f32 %v918_v14, %v718_v9  ;;  %v903_v27 = vadd.f32 %v902_v11, %v889_v18  ;;  %v2890_v9 = vld [vmem:[#allocation7 + $0x444] sm:$0xf]  ;;  %v2466_v11 = vld [vmem:[#allocation7 + $0x448] sm:$0xf0]  ;;  %v2903_v14 = vld [vmem:[#allocation7 + $0x4a4] sm:$0xf0] }
 0x25f   :  { %v2469_v12 = vor.u32 %v2890_v9, %v2466_v11  ;;  %v2618_v9 = vld [vmem:[#allocation7 + $0x578] sm:$0xf0]  ;;  %v2617_v11 = vor.u32 %v2929_v7, %v2616_v5  ;;  %v2649_v5 = vor.u32 %v2937_v4, %v2648_v3 }
 0x260   :  { %v933_v20 = vadd.f32 %v932_v17, %v919_v16  ;;  %v935_v21 = vmax.f32 %v903_v27, 0.0  ;;  %v2902_v16 = vld [vmem:[#allocation7 + $0x4a4] sm:$0xf]  ;;  %v2514_v17 = vld [vmem:[#allocation7 + $0x4a8] sm:$0xf0] }
 0x261   :  { %1428 = vmatpush.bf16.msrb.mxu0 %v2469_v12  ;;  %v2517_v18 = vor.u32 %v2902_v16, %v2514_v17  ;;  %v2458_v27 = vld [vmem:[#allocation7 + $0x438] sm:$0xf0]  ;;  %v2621_v12 = vor.u32 %v2928_v8, %v2618_v9  ;;  %v2592_v9 = vld [vmem:[#allocation7 + $0x540] sm:$0xf] }
 0x262   :  { %v938_v23 = vmax.f32 %v933_v20, 0.0  ;;  %v2456_v20 = vld [vmem:[#allocation7 + $0x430] sm:$0xf]  ;;  %v2650_v7 = vld [vmem:[#allocation7 + $0x5b8] sm:$0xf0] }
 0x263   :  { %v890_v24 = vpop.f32.mrf.mxu2  ;;  %1444 = vmatpush.bf16.msrb.mxu1 %v2517_v18  ;;  %v3247_v18 = vld [vmem:[#allocation10] sm:$0xff] }
 0x264   :  { %v940_v29 = vpack.c.bf16 %v938_v23, %v936_v22  ;;  %v891_v35 = vadd.f32 %v890_v24, %v717_v13  ;;  %v2512_v13 = vld [vmem:[#allocation7 + $0x4a0] sm:$0xf]  ;;  %v2889_v22 = vld [vmem:[#allocation7 + $0x434] sm:$0xf0]  ;;  %v2888_v23 = vld [vmem:[#allocation7 + $0x434] sm:$0xf] }
 0x265   :  { %v2513_v15 = vor.u32 %v2903_v14, %v2512_v13  ;;  %v2457_v24 = vor.u32 %v2889_v22, %v2456_v20  ;;  %v3244_v13 = vld [vmem:[#allocation10 + $0x8] sm:$0xff]  ;;  %v974_v20 = vperm.slane %v3247_v18, 5 }
 0x266   :  { %v905_v39 = vadd.f32 %v904_v38, %v891_v35  ;;  %1158 = vmatmul.bf16.vlgmr.msrb.gmra.mxu3 %v940_v29  ;;  %1186 = vmatmul.bf16.vlgmr.msra.gmra.mxu1 %v940_v29  ;;  %v2461_v29 = vor.u32 %v2888_v23, %v2458_v27  ;;  %v2504_v35 = vld [vmem:[#allocation7 + $0x490] sm:$0xf]  ;;  %v2901_v38 = vld [vmem:[#allocation7 + $0x494] sm:$0xf0]  ;;  %v975_v14 = vperm.slane %v3244_v13, 5  ;;  %v1236_v3 = vperm.slane %v3244_v13, 3 }
 0x267   :  { %1416 = vmatpush.bf16.msra.mxu3 %v2513_v15  ;;  %1401 = vmatpush.bf16.msra.mxu2 %v2457_v24 }
 0x268   :  { %v937_v40 = vmax.f32 %v905_v39, 0.0  ;;  %v2900_v39 = vld [vmem:[#allocation7 + $0x494] sm:$0xf]  ;;  %1429 = vmatpush.bf16.msrb.mxu0 %v2461_v29 }
 0x26a   :  { %v939_v41 = vpack.c.bf16 %v937_v40, %v935_v21  ;;  %v2505_v21 = vor.u32 %v2901_v38, %v2504_v35  ;;  %v2506_v40 = vld [vmem:[#allocation7 + $0x498] sm:$0xf0] }
 0x26b   :  { %1402 = vmatpush.bf16.msra.mxu2 %v2449_v30 }
 0x26c   :  { %1144 = vmatmul.bf16.vlgmr.msrb.gmra.mxu2 %v939_v41  ;;  %1172 = vmatmul.bf16.vlgmr.msra.gmra.mxu0 %v939_v41  ;;  %v2509_v41 = vor.u32 %v2900_v39, %v2506_v40 }
 0x26d   :  { %1417 = vmatpush.bf16.msra.mxu3 %v2505_v21  ;;  %1430 = vmatpush.bf16.msrb.mxu0 %v2453_v34 }
 0x26e   :  { %1445 = vmatpush.bf16.msrb.mxu1 %v2509_v41 }
 0x26f   :  { %1403 = vmatpush.bf16.msra.mxu2 %v2441_v28  ;;  %v2669_v28 = vor.u32 %v2940_v25, %v2666_v51  ;;  %v2624_v25 = vld [vmem:[#allocation7 + $0x580] sm:$0xf]  ;;  %v2930_v51 = vld [vmem:[#allocation7 + $0x584] sm:$0xf] }
 0x271   :  { %1418 = vmatpush.bf16.msra.mxu3 %v2497_v48  ;;  %1431 = vmatpush.bf16.msrb.mxu0 %v2445_v52  ;;  %v2927_v52 = vld [vmem:[#allocation7 + $0x564] sm:$0xf0] }
 0x272   :  { %1446 = vmatpush.bf16.msrb.mxu1 %v2501_v50  ;;  %v2941_v50 = vld [vmem:[#allocation7 + $0x5d4] sm:$0xf0] }
 0x273   :  { %1404 = vmatpush.bf16.msra.mxu2 %v2433_v56  ;;  %v2613_v56 = vor.u32 %v2926_v53, %v2610_v54  ;;  %v2568_v53 = vld [vmem:[#allocation7 + $0x510] sm:$0xf]  ;;  %v2916_v54 = vld [vmem:[#allocation7 + $0x514] sm:$0xf] }
 0x275   :  { %1432 = vmatpush.bf16.msrb.mxu0 %v2437_v58  ;;  %1668 = vmatpush.bf16.msrb.mxu3 %v2681_v62  ;;  %v2938_v58 = vld [vmem:[#allocation7 + $0x5c4] sm:$0xf]  ;;  %v2925_v62 = vld [vmem:[#allocation7 + $0x554] sm:$0xf0] }
 0x276   :  { %1696 = vmatpush.bf16.msra.mxu1 %v2685_v2  ;;  %v2661_v60 = vor.u32 %v2938_v58, %v2658_v59  ;;  %v2601_v0 = vor.u32 %v2925_v62, %v2600_v61  ;;  %v2605_v2 = vor.u32 %v2924_v63, %v2602_v1  ;;  %v2915_v58 = vld [vmem:[#allocation7 + $0x504] sm:$0xf0]  ;;  %v2914_v59 = vld [vmem:[#allocation7 + $0x504] sm:$0xf]  ;;  %v2562_v61 = vld [vmem:[#allocation7 + $0x508] sm:$0xf0] }
 0x277   :  { %1654 = vmatpush.bf16.msrb.mxu2 %v2617_v11  ;;  %v2922_v11 = vld [vmem:[#allocation7 + $0x544] sm:$0xf]  ;;  %v2565_v62 = vor.u32 %v2914_v59, %v2562_v61  ;;  %v2961_v63 = vld [vmem:[#allocation8 + $0x78] sm:$0xff] }
 0x279   :  { %1682 = vmatpush.bf16.msra.mxu0 %v2621_v12  ;;  %1669 = vmatpush.bf16.msrb.mxu3 %v2673_v6  ;;  %v2936_v6 = vld [vmem:[#allocation7 + $0x5b4] sm:$0xf] }
 0x27a   :  { %1697 = vmatpush.bf16.msra.mxu1 %v2677_v10  ;;  %v2653_v8 = vor.u32 %v2936_v6, %v2650_v7  ;;  %v2923_v10 = vld [vmem:[#allocation7 + $0x544] sm:$0xf0]  ;;  %v1235_v7 = vperm.slane %v3247_v18, 3 }
 0x27b   :  { %v2593_v12 = vor.u32 %v2923_v10, %v2592_v9 }
 0x27d   :  { %1683 = vmatpush.bf16.msra.mxu0 %v2613_v56 }
 0x27e   :  { %1698 = vmatpush.bf16.msra.mxu1 %v2669_v28 }
 0x281   :  { %1684 = vmatpush.bf16.msra.mxu0 %v2605_v2 }
 0x282   :  { %1699 = vmatpush.bf16.msra.mxu1 %v2661_v60 }
 0x286   :  { %1700 = vmatpush.bf16.msra.mxu1 %v2653_v8 }
 0x2e3   :  { %v1187_v15 = vpop.f32.mrf.mxu1 }
 0x2e9   :  { %v1173_v16 = vpop.f32.mrf.mxu0  ;;  %v1159_v22 = vpop.f32.mrf.mxu3 }
 0x2ea   :  { %v1174_v17 = vadd.f32 %v1173_v16, %v975_v14  ;;  %v2640_v16 = vld [vmem:[#allocation7 + $0x5a0] sm:$0xf] }
 0x2eb   :  { %v1189_v38 = vpop.f32.mrf.mxu1 }
 0x2ec   :  { %v1188_v24 = vadd.f32 %v1187_v15, %v1174_v17  ;;  %v2935_v17 = vld [vmem:[#allocation7 + $0x5a4] sm:$0xf0] }
 0x2ee   :  { %v1193_v39 = vmax.f32 %v1188_v24, 0.0 }
 0x2ef   :  { %v1145_v23 = vpop.f32.mrf.mxu2 }
 0x2f0   :  { %v1146_v29 = vadd.f32 %v1145_v23, %v974_v20  ;;  %v3251_v42 = vadd.f32 %v1193_v39, %v3224_v36  ;;  %v2642_v23 = vld [vmem:[#allocation7 + $0x5a8] sm:$0xf0]  ;;  %v2586_v39 = vld [vmem:[#allocation7 + $0x538] sm:$0xf0] }
 0x2f1   :  { %v1175_v27 = vpop.f32.mrf.mxu0  ;;  %v1161_v33 = vpop.f32.mrf.mxu3 }
 0x2f2   :  { %v1176_v35 = vadd.f32 %v1175_v27, %v975_v14  ;;  %v1160_v40 = vadd.f32 %v1159_v22, %v1146_v29  ;;  %v2594_v14 = vld [vmem:[#allocation7 + $0x548] sm:$0xf0]  ;;  %v2641_v22 = vor.u32 %v2935_v17, %v2640_v16  ;;  %v2584_v27 = vld [vmem:[#allocation7 + $0x530] sm:$0xf]  ;;  %v2921_v29 = vld [vmem:[#allocation7 + $0x534] sm:$0xf0] }
 0x2f3   :  { %v2597_v15 = vor.u32 %v2922_v11, %v2594_v14 }
 0x2f4   :  { %v1190_v21 = vadd.f32 %v1189_v38, %v1176_v35  ;;  %v1192_v34 = vmax.f32 %v1160_v40, 0.0  ;;  %v2920_v35 = vld [vmem:[#allocation7 + $0x534] sm:$0xf]  ;;  %v2585_v38 = vor.u32 %v2921_v29, %v2584_v27  ;;  %v2632_v40 = vld [vmem:[#allocation7 + $0x590] sm:$0xf] }
 0x2f5   :  { %1685 = vmatpush.bf16.msra.mxu0 %v2597_v15 }
 0x2f6   :  { %v1195_v41 = vmax.f32 %v1190_v21, 0.0  ;;  %v3259_v48 = vadd.f32 %v1192_v34, %v3234_v44  ;;  %v2609_v44 = vor.u32 %v2927_v52, %v2608_v32  ;;  %v2589_v21 = vor.u32 %v2920_v35, %v2586_v39  ;;  %v2626_v32 = vld [vmem:[#allocation7 + $0x588] sm:$0xf0]  ;;  %v2953_v39 = vld [vmem:[#allocation8 + $0x38] sm:$0xff] }
 0x2f7   :  { %v1147_v19 = vpop.f32.mrf.mxu2  ;;  %v2629_v52 = vor.u32 %v2930_v51, %v2626_v32  ;;  %v1492_v32 = vperm.slane %v3247_v18, 6 }
 0x2f8   :  { %v3254_v43 = vadd.f32 %v1195_v41, %v3228_v37  ;;  %v1148_v30 = vadd.f32 %v1147_v19, %v974_v20  ;;  %v2664_v37 = vld [vmem:[#allocation7 + $0x5d0] sm:$0xf]  ;;  %1655 = vmatpush.bf16.msrb.mxu2 %v2609_v44  ;;  %v2934_v20 = vld [vmem:[#allocation7 + $0x5a4] sm:$0xf]  ;;  %v2933_v41 = vld [vmem:[#allocation7 + $0x594] sm:$0xf0] }
 0x2f9   :  { %v2665_v31 = vor.u32 %v2941_v50, %v2664_v37  ;;  %v2645_v24 = vor.u32 %v2934_v20, %v2642_v23  ;;  %v2932_v19 = vld [vmem:[#allocation7 + $0x594] sm:$0xf]  ;;  %1686 = vmatpush.bf16.msra.mxu0 %v2589_v21  ;;  %v2578_v37 = vld [vmem:[#allocation7 + $0x528] sm:$0xf0]  ;;  %v2917_v44 = vld [vmem:[#allocation7 + $0x514] sm:$0xf0] }
 0x2fa   :  { %v1201_v45 = vpack.c.bf16 %v3254_v43, %v3251_v42  ;;  %v1162_v46 = vadd.f32 %v1161_v33, %v1148_v30  ;;  %v2633_v30 = vor.u32 %v2933_v41, %v2632_v40  ;;  %v2634_v33 = vld [vmem:[#allocation7 + $0x598] sm:$0xf0]  ;;  %v2959_v21 = vld [vmem:[#allocation8 + $0x68] sm:$0xff]  ;;  %v2952_v40 = vld [vmem:[#allocation8 + $0x30] sm:$0xff] }
 0x2fb   :  { %1670 = vmatpush.bf16.msrb.mxu3 %v2665_v31  ;;  %1701 = vmatpush.bf16.msra.mxu1 %v2645_v24  ;;  %v2637_v34 = vor.u32 %v2932_v19, %v2634_v33  ;;  %v2931_v31 = vld [vmem:[#allocation7 + $0x584] sm:$0xf0]  ;;  %v2958_v41 = vld [vmem:[#allocation8 + $0x60] sm:$0xff] }
 0x2fc   :  { %v1194_v47 = vmax.f32 %v1162_v46, 0.0  ;;  %1419 = vmatmul.bf16.vlgmr.msra.gmra.mxu3 %v1201_v45  ;;  %1447 = vmatmul.bf16.vlgmr.msrb.gmra.mxu1 %v1201_v45  ;;  %v2576_v45 = vld [vmem:[#allocation7 + $0x520] sm:$0xf]  ;;  %v2919_v46 = vld [vmem:[#allocation7 + $0x524] sm:$0xf0]  ;;  %v2625_v28 = vor.u32 %v2931_v31, %v2624_v25  ;;  %v1493_v25 = vperm.slane %v3244_v13, 6 }
 0x2fd   :  { %1656 = vmatpush.bf16.msrb.mxu2 %v2601_v0  ;;  %v2960_v0 = vld [vmem:[#allocation8 + $0x70] sm:$0xff]  ;;  %v2951_v19 = vld [vmem:[#allocation8 + $0x28] sm:$0xff]  ;;  %v2950_v33 = vld [vmem:[#allocation8 + $0x20] sm:$0xff] }
 0x2fe   :  { %v3262_v49 = vadd.f32 %v1194_v47, %v3238_v26  ;;  %v2939_v26 = vld [vmem:[#allocation7 + $0x5c4] sm:$0xf0]  ;;  %v2918_v47 = vld [vmem:[#allocation7 + $0x524] sm:$0xf] }
 0x2ff   :  { %v2657_v57 = vor.u32 %v2939_v26, %v2656_v55  ;;  %1702 = vmatpush.bf16.msra.mxu1 %v2637_v34  ;;  %v2581_v50 = vor.u32 %v2918_v47, %v2578_v37  ;;  %v2569_v55 = vor.u32 %v2917_v44, %v2568_v53  ;;  %v2570_v26 = vld [vmem:[#allocation7 + $0x518] sm:$0xf0]  ;;  %v2956_v34 = vld [vmem:[#allocation8 + $0x50] sm:$0xff]  ;;  %v2947_v37 = vld [vmem:[#allocation8 + $0x8] sm:$0xff] }
 0x300   :  { %v1200_v36 = vpack.c.bf16 %v3262_v49, %v3259_v48  ;;  %v2573_v56 = vor.u32 %v2916_v54, %v2570_v26  ;;  %v2948_v47 = vld [vmem:[#allocation8 + $0x10] sm:$0xff] }
 0x301   :  { %1671 = vmatpush.bf16.msrb.mxu3 %v2657_v57  ;;  %1657 = vmatpush.bf16.msrb.mxu2 %v2593_v12  ;;  %v2560_v57 = vld [vmem:[#allocation7 + $0x500] sm:$0xf] }
 0x302   :  { %1405 = vmatmul.bf16.vlgmr.msra.gmra.mxu2 %v1200_v36  ;;  %1433 = vmatmul.bf16.vlgmr.msrb.gmra.mxu0 %v1200_v36  ;;  %v2577_v36 = vor.u32 %v2919_v46, %v2576_v45  ;;  %v2561_v60 = vor.u32 %v2915_v58, %v2560_v57  ;;  %v2949_v45 = vld [vmem:[#allocation8 + $0x18] sm:$0xff]  ;;  %v2955_v46 = vld [vmem:[#allocation8 + $0x48] sm:$0xff] }
 0x303   :  { %1687 = vmatpush.bf16.msra.mxu0 %v2581_v50  ;;  %1703 = vmatpush.bf16.msra.mxu1 %v2629_v52  ;;  %v2946_v50 = vld [vmem:[#allocation8] sm:$0xff] }
 0x305   :  { %1672 = vmatpush.bf16.msrb.mxu3 %v2649_v5  ;;  %1658 = vmatpush.bf16.msrb.mxu2 %v2585_v38 }
 0x307   :  { %1688 = vmatpush.bf16.msra.mxu0 %v2573_v56 }
 0x309   :  { %1673 = vmatpush.bf16.msrb.mxu3 %v2641_v22  ;;  %1659 = vmatpush.bf16.msrb.mxu2 %v2577_v36  ;;  %v2954_v36 = vld [vmem:[#allocation8 + $0x40] sm:$0xff] }
 0x30b   :  { %1689 = vmatpush.bf16.msra.mxu0 %v2565_v62 }
 0x30d   :  { %1674 = vmatpush.bf16.msrb.mxu3 %v2633_v30  ;;  %1660 = vmatpush.bf16.msrb.mxu2 %v2569_v55  ;;  %v2957_v30 = vld [vmem:[#allocation8 + $0x58] sm:$0xff] }
 0x311   :  { %1675 = vmatpush.bf16.msrb.mxu3 %v2625_v28  ;;  %1661 = vmatpush.bf16.msrb.mxu2 %v2561_v60 }
 0x315   :  { %1863 = vmatpush.bf16.msra.mxu3 %v2961_v63  ;;  %1849 = vmatpush.bf16.msra.mxu2 %v2953_v39 }
 0x319   :  { %1864 = vmatpush.bf16.msra.mxu3 %v2960_v0  ;;  %1850 = vmatpush.bf16.msra.mxu2 %v2952_v40 }
 0x31d   :  { %1865 = vmatpush.bf16.msra.mxu3 %v2959_v21  ;;  %1851 = vmatpush.bf16.msra.mxu2 %v2951_v19 }
 0x321   :  { %1866 = vmatpush.bf16.msra.mxu3 %v2958_v41  ;;  %1852 = vmatpush.bf16.msra.mxu2 %v2950_v33 }
 0x325   :  { %1867 = vmatpush.bf16.msra.mxu3 %v2957_v30  ;;  %1853 = vmatpush.bf16.msra.mxu2 %v2949_v45 }
 0x329   :  { %1868 = vmatpush.bf16.msra.mxu3 %v2956_v34  ;;  %1854 = vmatpush.bf16.msra.mxu2 %v2948_v47 }
 0x32d   :  { %1869 = vmatpush.bf16.msra.mxu3 %v2955_v46  ;;  %1855 = vmatpush.bf16.msra.mxu2 %v2947_v37 }
 0x331   :  { %1870 = vmatpush.bf16.msra.mxu3 %v2954_v36  ;;  %1856 = vmatpush.bf16.msra.mxu2 %v2946_v50 }
 0x379   :  { %v1448_v1 = vpop.f32.mrf.mxu1 }
 0x37f   :  { %v1434_v2 = vpop.f32.mrf.mxu0  ;;  %v1420_v5 = vpop.f32.mrf.mxu3 }
 0x380   :  { %v1435_v4 = vadd.f32 %v1434_v2, %v1236_v3 }
 0x381   :  { %v1450_v11 = vpop.f32.mrf.mxu1 }
 0x382   :  { %v1449_v9 = vadd.f32 %v1448_v1, %v1435_v4 }
 0x384   :  { %v1454_v15 = vmax.f32 %v1449_v9, 0.0 }
 0x385   :  { %v1406_v6 = vpop.f32.mrf.mxu2 }
 0x386   :  { %v1407_v12 = vadd.f32 %v1406_v6, %v1235_v7 }
 0x387   :  { %v1436_v8 = vpop.f32.mrf.mxu0  ;;  %v1422_v24 = vpop.f32.mrf.mxu3 }
 0x388   :  { %v1437_v10 = vadd.f32 %v1436_v8, %v1236_v3  ;;  %v1421_v20 = vadd.f32 %v1420_v5, %v1407_v12  ;;  %v1752_v8 = vperm.slane %v3247_v18, 7 }
 0x38a   :  { %v1451_v14 = vadd.f32 %v1450_v11, %v1437_v10  ;;  %v1453_v29 = vmax.f32 %v1421_v20, 0.0 }
 0x38c   :  { %v1456_v16 = vmax.f32 %v1451_v14, 0.0 }
 0x38d   :  { %v1408_v17 = vpop.f32.mrf.mxu2 }
 0x38e   :  { %v1458_v22 = vpack.c.bf16 %v1456_v16, %v1454_v15  ;;  %v1409_v23 = vadd.f32 %v1408_v17, %v1235_v7 }
 0x390   :  { %v1423_v27 = vadd.f32 %v1422_v24, %v1409_v23  ;;  %1676 = vmatmul.bf16.vlgmr.msrb.gmra.mxu3 %v1458_v22  ;;  %1704 = vmatmul.bf16.vlgmr.msra.gmra.mxu1 %v1458_v22 }
 0x392   :  { %v1455_v35 = vmax.f32 %v1423_v27, 0.0 }
 0x394   :  { %v1457_v38 = vpack.c.bf16 %v1455_v35, %v1453_v29 }
 0x396   :  { %1662 = vmatmul.bf16.vlgmr.msrb.gmra.mxu2 %v1457_v38  ;;  %1690 = vmatmul.bf16.vlgmr.msra.gmra.mxu0 %v1457_v38 }
 0x40d   :  { %v1705_v31 = vpop.f32.mrf.mxu1 }
 0x413   :  { %v1691_v51 = vpop.f32.mrf.mxu0  ;;  %v1677_v52 = vpop.f32.mrf.mxu3 }
 0x414   :  { %v1692_v28 = vadd.f32 %v1691_v51, %v1493_v25 }
 0x415   :  { %v1707_v56 = vpop.f32.mrf.mxu1 }
 0x416   :  { %v1706_v44 = vadd.f32 %v1705_v31, %v1692_v28 }
 0x418   :  { %v1711_v57 = vmax.f32 %v1706_v44, 0.0 }
 0x419   :  { %v1663_v53 = vpop.f32.mrf.mxu2 }
 0x41a   :  { %v1664_v55 = vadd.f32 %v1663_v53, %v1492_v32  ;;  %v1715_v62 = vadd.f32 %v1711_v57, %v3251_v42 }
 0x41b   :  { %v1693_v54 = vpop.f32.mrf.mxu0  ;;  %v1679_v0 = vpop.f32.mrf.mxu3 }
 0x41c   :  { %v1694_v26 = vadd.f32 %v1693_v54, %v1493_v25  ;;  %v1678_v59 = vadd.f32 %v1677_v52, %v1664_v55 }
 0x41e   :  { %v1708_v58 = vadd.f32 %v1707_v56, %v1694_v26  ;;  %v1710_v1 = vmax.f32 %v1678_v59, 0.0 }
 0x420   :  { %v1713_v60 = vmax.f32 %v1708_v58, 0.0  ;;  %v1714_v5 = vadd.f32 %v1710_v1, %v3259_v48 }
 0x421   :  { %v1665_v61 = vpop.f32.mrf.mxu2 }
 0x422   :  { %v1717_v13 = vadd.f32 %v1713_v60, %v3254_v43  ;;  %v1666_v63 = vadd.f32 %v1665_v61, %v1492_v32 }
 0x424   :  { %v1719_v2 = vpack.c.bf16 %v1717_v13, %v1715_v62  ;;  %v1680_v3 = vadd.f32 %v1679_v0, %v1666_v63 }
 0x426   :  { %v1712_v4 = vmax.f32 %v1680_v3, 0.0  ;;  %1871 = vmatmul.bf16.vlgmr.msra.gmra.mxu3 %v1719_v2 }
 0x428   :  { %v1716_v6 = vadd.f32 %v1712_v4, %v3262_v49 }
 0x42a   :  { %v1718_v7 = vpack.c.bf16 %v1716_v6, %v1714_v5 }
 0x42c   :  { %1857 = vmatmul.bf16.vlgmr.msra.gmra.mxu2 %v1718_v7 }
 0x4a9   :  { %v1872_v9 = vpop.f32.mrf.mxu3 }
 0x4af   :  { %v1858_v10 = vpop.f32.mrf.mxu2 }
 0x4b0   :  { %v1859_v42 = vadd.f32 %v1858_v10, %v1752_v8 }
 0x4b1   :  { %v1874_v48 = vpop.f32.mrf.mxu3 }
 0x4b2   :  { %v1873_v11 = vadd.f32 %v1872_v9, %v1859_v42 }
 0x4b4   :  { %1877 = vst [vmem:[#allocation11] sm:$0xff] %v1873_v11 }
 0x4b7   :  { %v1860_v43 = vpop.f32.mrf.mxu2 }
 0x4b8   :  { %v1861_v12 = vadd.f32 %v1860_v43, %v1752_v8 }
 0x4ba   :  { %v1875_v14 = vadd.f32 %v1874_v48, %v1861_v12 }
 0x4bc   :  { %1878 = vst [vmem:[#allocation11 + $0x8] sm:$0xff] %v1875_v14 }
 0x4bd   :  { %1891 = dma.vmem_to_hbm [thread:$0]  %s1884_s4, 256, %s1886_s21, [#allocation4], %s3127_s26, %s3127_s26, %s3128_s27  }
 0x4be   :  { %3124 = dma.done.wait [#allocation4], 256  }
 0x4bf   :  { %3125 = vsyncadd [#allocation4], 4294967040 }
 0x4c0   :  { %1896 = vsyncpa [#allocation3], 1 }
 0x4c1   :  { %1897 = vsyncpa [#allocation6], 1 }
 0x4c2   :  { %1898 = vsyncpa [#allocation9], 1 }
 0x4c3   :  { %1899 = vsyncpa [#allocation4], 1 }

</bundles_post_ra>
